<compile_context>
chip_gen: v7x
topology: tpu7x:2x2x1
jax: 0.10.0
libtpu: 0.0.40
codegen_flags: <defaults>
</compile_context>

<pallas_src>
import functools

import jax
import jax.numpy as jnp
import numpy as np
from jax import lax
from jax.experimental import pallas as pl
from jax.experimental.pallas import tpu as pltpu


def _vmem_limit_bytes():
    """Pipeline VMEM budget with headroom on every TPU generation."""
    try:
        cap = pltpu.get_tpu_info().vmem_capacity_bytes
    except Exception:
        cap = 64 * 1024 * 1024
    return int(min(96 * 1024 * 1024, cap * 3 // 4))


def _pick_row_tile(h, w, k_pad):
    """Largest row tile TH dividing H with >= 2 tiles such that the flattened
    tile width TH*W is a multiple of 128 (lane-dense channel-major stores) and
    the (TH*W, K_pad) im2col scratch stays small.  Falls back to TH = H
    (block == full axis, always spec-legal)."""
    budget_rows = max(256, (4 * 1024 * 1024) // (4 * k_pad))
    for th in range(h // 2, 0, -1):
        if h % th != 0:
            continue
        if (th * w) % 128 != 0:
            continue
        if th * w > budget_rows:
            continue
        return th
    return h


def _dwsep_conv_kernel(KH, KW, PH, PW,
                       x_ref, w2t_ref, out_ref, ssum_ref, ssq_ref,
                       xp_scr, pt_scr):
    """Fused depthwise(KHxKW, stride 1, 'same' pad) + pointwise(1x1) conv.

    Grid = (batch n, row tile r).

    x_ref   : (1, H, W, Cin)        full unpadded NHWC image (VMEM-resident over r)
    w2t_ref : (Cout, K_pad)         fused depthwise*pointwise weight, K zero-padded
    out_ref : (1, Cout, TH*W)       channel-major conv rows [r*TH, r*TH+TH)
    ssum_ref: (1, Cout, 1)          per-batch sum_{h,w} out      (acc over r)
    ssq_ref : (1, Cout, 1)          per-batch sum_{h,w} out**2   (acc over r)
    xp_scr  : (H+2PH, W+2PW, Cin)   zero-padded image scratch
    pt_scr  : (TH*W, K_pad)         im2col patch scratch (pad columns stay zero)
    """
    H, W, Cin = x_ref.shape[1], x_ref.shape[2], x_ref.shape[3]
    Cout, TS = out_ref.shape[1], out_ref.shape[2]
    TH = TS // W

    r = pl.program_id(1)

    # New batch element: build the zero-padded image once (the input block is
    # VMEM-resident across row tiles), zero the patch scratch (keeps the K
    # padding columns at 0) and reset the BN partial-sum accumulators.
    @pl.when(r == 0)
    def _():
        xp_scr[...] = jnp.zeros_like(xp_scr)
        xp_scr[PH:PH + H, PW:PW + W, :] = x_ref[0]
        pt_scr[...] = jnp.zeros_like(pt_scr)
        ssum_ref[...] = jnp.zeros_like(ssum_ref)
        ssq_ref[...] = jnp.zeros_like(ssq_ref)

    # Mini-im2col: the KH*KW shifted (TH, W, Cin) windows laid side by side
    # along the K axis (order matches the fused-weight stacking order).
    row0 = pl.multiple_of(r * TH, TH)
    for kh in range(KH):
        for kw in range(KW):
            tap = kh * KW + kw
            win = xp_scr[pl.ds(row0 + kh, TH), kw:kw + W, :]        # (TH, W, Cin)
            pt_scr[:, tap * Cin:(tap + 1) * Cin] = win.reshape(TS, Cin)

    # Single MXU matmul, transposed RHS (contract both minor dims):
    #   out_t[c, s] = sum_k w2t[c, k] * patches[s, k]   -> (Cout, TH*W)
    # Channel-major result => lane-dense stores (minor dim = TH*W, mult of 128).
    out_t = lax.dot_general(
        w2t_ref[...], pt_scr[...],
        dimension_numbers=(((1,), (1,)), ((), ())),
        preferred_element_type=jnp.float32)
    out_ref[0] = out_t

    # Partial BatchNorm statistics -> no extra HBM read of the intermediate.
    ssum_ref[0] += jnp.sum(out_t, axis=1, keepdims=True)
    ssq_ref[0] += jnp.sum(out_t * out_t, axis=1, keepdims=True)


def _bn_relu_kernel(x_ref, scale_ref, shift_ref, out_ref):
    """Fused BatchNorm (pre-folded scale/shift) + ReLU on one channel-major tile.

    x_ref    : (1, Cout, TH*W)
    scale_ref: (Cout, 1)
    shift_ref: (Cout, 1)
    """
    y = x_ref[0] * scale_ref[...] + shift_ref[...]
    out_ref[0] = jnp.maximum(y, 0.0)


def depthwise_separable_conv(x_nchw, dw_w, pw_w, gamma, beta, eps=1e-5):
    """Forward pass matching the PyTorch module (training-mode BN: batch stats).

    x_nchw: (N, Cin, H, W) float32
    dw_w  : (Cin, 1, KH, KW)   depthwise Conv2d weight (groups=Cin, bias=False)
    pw_w  : (Cout, Cin, 1, 1)  pointwise Conv2d weight (bias=False)
    gamma, beta: (Cout,)       BatchNorm2d affine parameters
    returns: (N, Cout, H, W)
    """
    N, Cin, H, W = x_nchw.shape
    Cout = pw_w.shape[0]
    KH, KW = dw_w.shape[2], dw_w.shape[3]
    PH, PW = KH // 2, KW // 2          # module defaults: kernel=3, stride=1, pad=1

    # NCHW -> NHWC so channels sit on the lane axis for the im2col contraction.
    x = jnp.transpose(x_nchw, (0, 2, 3, 1))

    # Fold depthwise into pointwise (channel-major weight):
    #   w2t[o, (kh*KW + kw)*Cin + c] = pw[o, c] * dw[c, 0, kh, kw]
    # K is zero-padded to a multiple of 128 lanes so the transposed-RHS matmul
    # operands stay fully (8,128)-aligned.
    K = KH * KW * Cin
    K_pad = ((K + 127) // 128) * 128
    dw_k = jnp.transpose(dw_w[:, 0, :, :], (1, 2, 0))            # (KH, KW, Cin)
    pw_k = pw_w[:, :, 0, 0]                                      # (Cout, Cin)
    w2t = (pw_k[:, None, None, :] * dw_k[None]).reshape(Cout, K)
    w2t = jnp.pad(w2t, ((0, 0), (0, K_pad - K)))

    TH = _pick_row_tile(H, W, K_pad)
    RT = H // TH
    TS = TH * W
    vmem_limit = _vmem_limit_bytes()

    conv, ssum, ssq = pl.pallas_call(
        functools.partial(_dwsep_conv_kernel, KH, KW, PH, PW),
        out_shape=(
            jax.ShapeDtypeStruct((N, Cout, H * W), jnp.float32),
            jax.ShapeDtypeStruct((N, Cout, 1), jnp.float32),
            jax.ShapeDtypeStruct((N, Cout, 1), jnp.float32),
        ),
        grid=(N, RT),
        in_specs=[
            # Full image per batch element; index_map ignores r, so the block
            # is fetched once and stays VMEM-resident across the row tiles.
            pl.BlockSpec((1, H, W, Cin), lambda n, r: (n, 0, 0, 0)),
            pl.BlockSpec((Cout, K_pad), lambda n, r: (0, 0)),
        ],
        out_specs=(
            pl.BlockSpec((1, Cout, TS), lambda n, r: (n, 0, r)),
            pl.BlockSpec((1, Cout, 1), lambda n, r: (n, 0, 0)),   # acc over r
            pl.BlockSpec((1, Cout, 1), lambda n, r: (n, 0, 0)),   # acc over r
        ),
        scratch_shapes=[
            pltpu.VMEM((H + 2 * PH, W + 2 * PW, Cin), jnp.float32),
            pltpu.VMEM((TS, K_pad), jnp.float32),
        ],
        compiler_params=pltpu.CompilerParams(
            dimension_semantics=("parallel", "arbitrary"),
            vmem_limit_bytes=vmem_limit,
        ),
    )(x, w2t)

    # BatchNorm2d training-mode statistics over (N, H, W), biased variance.
    # Heavy reductions were done in-kernel; only a tiny (N, Cout, 1) sum here.
    cnt = jnp.float32(N * H * W)
    mean = jnp.sum(ssum, axis=0)[:, 0] / cnt
    var = jnp.maximum(jnp.sum(ssq, axis=0)[:, 0] / cnt - mean * mean, 0.0)
    scale = gamma * lax.rsqrt(var + eps)
    shift = beta - mean * scale

    out = pl.pallas_call(
        _bn_relu_kernel,
        out_shape=jax.ShapeDtypeStruct((N, Cout, H * W), jnp.float32),
        grid=(N, RT),
        in_specs=[
            pl.BlockSpec((1, Cout, TS), lambda n, r: (n, 0, r)),
            pl.BlockSpec((Cout, 1), lambda n, r: (0, 0)),
            pl.BlockSpec((Cout, 1), lambda n, r: (0, 0)),
        ],
        out_specs=pl.BlockSpec((1, Cout, TS), lambda n, r: (n, 0, r)),
        compiler_params=pltpu.CompilerParams(
            dimension_semantics=("parallel", "parallel"),
            vmem_limit_bytes=vmem_limit,
        ),
    )(conv, scale.reshape(Cout, 1), shift.reshape(Cout, 1))

    # Channel-major layout => the NCHW result is a pure (free) reshape.
    return out.reshape(N, Cout, H, W)


def _reference(x_nchw, dw_w, pw_w, gamma, beta, eps=1e-5):
    """Pure-JAX reference (lax convs) for correctness checking."""
    dn = ("NCHW", "OIHW", "NCHW")
    Cin = x_nchw.shape[1]
    y = lax.conv_general_dilated(x_nchw, dw_w, (1, 1), ((1, 1), (1, 1)),
                                 feature_group_count=Cin, dimension_numbers=dn)
    y = lax.conv_general_dilated(y, pw_w, (1, 1), ((0, 0), (0, 0)),
                                 dimension_numbers=dn)
    mean = jnp.mean(y, axis=(0, 2, 3), keepdims=True)
    var = jnp.mean((y - mean) ** 2, axis=(0, 2, 3), keepdims=True)
    yhat = (y - mean) / jnp.sqrt(var + eps)
    y = yhat * gamma.reshape(1, -1, 1, 1) + beta.reshape(1, -1, 1, 1)
    return jnp.maximum(y, 0.0)


if __name__ == "__main__":
    key = jax.random.PRNGKey(0)
    k_x, k_dw, k_pw = jax.random.split(key, 3)

    N, Cin, Cout, H, W = 2, 4, 8, 16, 16

    x = jax.random.normal(k_x, (N, Cin, H, W), dtype=jnp.float32)
    # Parameter shapes match the PyTorch module:
    dw_w = 0.1 * jax.random.normal(k_dw, (Cin, 1, 3, 3), dtype=jnp.float32)      # depthwise
    pw_w = 0.1 * jax.random.normal(k_pw, (Cout, Cin, 1, 1), dtype=jnp.float32)   # pointwise
    gamma = jnp.ones((Cout,), dtype=jnp.float32)   # BatchNorm2d default init
    beta = jnp.zeros((Cout,), dtype=jnp.float32)

    fwd = jax.jit(depthwise_separable_conv)
    out = jax.block_until_ready(fwd(x, dw_w, pw_w, gamma, beta))

    ref = jax.block_until_ready(_reference(x, dw_w, pw_w, gamma, beta))
    assert out.shape == (N, Cout, H, W), out.shape
    np.testing.assert_allclose(np.asarray(out), np.asarray(ref), rtol=1e-4, atol=1e-4)

    print("KERNEL_OK")
</pallas_src>

<mosaic_0001>
module attributes {stable_mosaic.version = 11 : i64} {
  func.func @_dwsep_conv_kernel(%arg0: i32, %arg1: i32, %arg2: memref<1x16x16x4xf32, #tpu.memory_space<vmem>>, %arg3: memref<8x128xf32, #tpu.memory_space<vmem>>, %arg4: memref<1x8x128xf32, #tpu.memory_space<vmem>>, %arg5: memref<1x8x1xf32, #tpu.memory_space<vmem>>, %arg6: memref<1x8x1xf32, #tpu.memory_space<vmem>>, %arg7: memref<18x18x4xf32, #tpu.memory_space<vmem>>, %arg8: memref<128x128xf32, #tpu.memory_space<vmem>>) attributes {dimension_semantics = [#tpu.dimension_semantics<parallel>, #tpu.dimension_semantics<arbitrary>], iteration_bounds = array<i64: 2, 2>, scalar_prefetch = 0 : i64, scratch_operands = 2 : i64, tpu.core_type = #tpu.core_type<tc>, window_params = [{transform_indices = @transform_0, window_bounds = array<i64: 1, 16, 16, 4>}, {pipeline_mode = #tpu.pipeline_mode<synchronous>, transform_indices = @transform_1, window_bounds = array<i64: 8, 128>}, {transform_indices = @transform_2, window_bounds = array<i64: 1, 8, 128>}, {transform_indices = @transform_3, window_bounds = array<i64: 1, 8, 1>}, {transform_indices = @transform_4, window_bounds = array<i64: 1, 8, 1>}]} {
    %c0_i32 = arith.constant 0 : i32
    %0 = arith.cmpi eq, %arg1, %c0_i32 : i32
    %1 = arith.extui %0 : i1 to i32
    %c0_i32_0 = arith.constant 0 : i32
    %2 = arith.cmpi ne, %1, %c0_i32_0 : i32
    scf.if %2 {
      %cst_54 = arith.constant 0.000000e+00 : f32
      %73 = vector.broadcast %cst_54 : f32 to vector<18x18x4xf32>
      %c0_55 = arith.constant 0 : index
      %c0_56 = arith.constant 0 : index
      %c0_57 = arith.constant 0 : index
      %74 = vector.load %arg7[%c0_55, %c0_56, %c0_57] : memref<18x18x4xf32, #tpu.memory_space<vmem>>, vector<18x18x4xf32>
      tpu.vector_store %arg7[%c0_55, %c0_56, %c0_57], %73 {strides = array<i32>} : memref<18x18x4xf32, #tpu.memory_space<vmem>>, vector<18x18x4xf32>,
      %c0_58 = arith.constant 0 : index
      %c0_59 = arith.constant 0 : index
      %c0_60 = arith.constant 0 : index
      %c0_61 = arith.constant 0 : index
      %75 = vector.load %arg2[%c0_58, %c0_59, %c0_60, %c0_61] : memref<1x16x16x4xf32, #tpu.memory_space<vmem>>, vector<1x16x16x4xf32>
      %76 = vector.shape_cast %75 : vector<1x16x16x4xf32> to vector<16x16x4xf32>
      %c1_62 = arith.constant 1 : index
      %c1_63 = arith.constant 1 : index
      %c0_64 = arith.constant 0 : index
      %77 = vector.load %arg7[%c1_62, %c1_63, %c0_64] : memref<18x18x4xf32, #tpu.memory_space<vmem>>, vector<16x16x4xf32>
      tpu.vector_store %arg7[%c1_62, %c1_63, %c0_64], %76 {strides = array<i32>} : memref<18x18x4xf32, #tpu.memory_space<vmem>>, vector<16x16x4xf32>,
      %cst_65 = arith.constant 0.000000e+00 : f32
      %78 = vector.broadcast %cst_65 : f32 to vector<128x128xf32>
      %c0_66 = arith.constant 0 : index
      %c0_67 = arith.constant 0 : index
      %79 = vector.load %arg8[%c0_66, %c0_67] : memref<128x128xf32, #tpu.memory_space<vmem>>, vector<128x128xf32>
      tpu.vector_store %arg8[%c0_66, %c0_67], %78 {strides = array<i32>} : memref<128x128xf32, #tpu.memory_space<vmem>>, vector<128x128xf32>,
      %cst_68 = arith.constant 0.000000e+00 : f32
      %80 = vector.broadcast %cst_68 : f32 to vector<1x8x1xf32>
      %c0_69 = arith.constant 0 : index
      %c0_70 = arith.constant 0 : index
      %c0_71 = arith.constant 0 : index
      %81 = vector.load %arg5[%c0_69, %c0_70, %c0_71] : memref<1x8x1xf32, #tpu.memory_space<vmem>>, vector<1x8x1xf32>
      tpu.vector_store %arg5[%c0_69, %c0_70, %c0_71], %80 {strides = array<i32>} : memref<1x8x1xf32, #tpu.memory_space<vmem>>, vector<1x8x1xf32>,
      %cst_72 = arith.constant 0.000000e+00 : f32
      %82 = vector.broadcast %cst_72 : f32 to vector<1x8x1xf32>
      %c0_73 = arith.constant 0 : index
      %c0_74 = arith.constant 0 : index
      %c0_75 = arith.constant 0 : index
      %83 = vector.load %arg6[%c0_73, %c0_74, %c0_75] : memref<1x8x1xf32, #tpu.memory_space<vmem>>, vector<1x8x1xf32>
      tpu.vector_store %arg6[%c0_73, %c0_74, %c0_75], %82 {strides = array<i32>} : memref<1x8x1xf32, #tpu.memory_space<vmem>>, vector<1x8x1xf32>,
    } else {
    }
    %c8_i32 = arith.constant 8 : i32
    %3 = arith.muli %arg1, %c8_i32 : i32
    %4 = tpu.assume_multiple %3, 8 : i32
    %c0_i32_1 = arith.constant 0 : i32
    %5 = arith.addi %4, %c0_i32_1 : i32
    %6 = arith.index_cast %5 : i32 to index
    %c0 = arith.constant 0 : index
    %c0_2 = arith.constant 0 : index
    %7 = vector.load %arg7[%6, %c0, %c0_2] : memref<18x18x4xf32, #tpu.memory_space<vmem>>, vector<8x16x4xf32>
    %8 = vector.shape_cast %7 : vector<8x16x4xf32> to vector<128x4xf32>
    %c0_3 = arith.constant 0 : index
    %c0_4 = arith.constant 0 : index
    %9 = vector.load %arg8[%c0_3, %c0_4] : memref<128x128xf32, #tpu.memory_space<vmem>>, vector<128x4xf32>
    tpu.vector_store %arg8[%c0_3, %c0_4], %8 {strides = array<i32>} : memref<128x128xf32, #tpu.memory_space<vmem>>, vector<128x4xf32>,
    %c0_i32_5 = arith.constant 0 : i32
    %10 = arith.addi %4, %c0_i32_5 : i32
    %11 = arith.index_cast %10 : i32 to index
    %c1 = arith.constant 1 : index
    %c0_6 = arith.constant 0 : index
    %12 = vector.load %arg7[%11, %c1, %c0_6] : memref<18x18x4xf32, #tpu.memory_space<vmem>>, vector<8x16x4xf32>
    %13 = vector.shape_cast %12 : vector<8x16x4xf32> to vector<128x4xf32>
    %c0_7 = arith.constant 0 : index
    %c4 = arith.constant 4 : index
    %14 = vector.load %arg8[%c0_7, %c4] : memref<128x128xf32, #tpu.memory_space<vmem>>, vector<128x4xf32>
    tpu.vector_store %arg8[%c0_7, %c4], %13 {strides = array<i32>} : memref<128x128xf32, #tpu.memory_space<vmem>>, vector<128x4xf32>,
    %c0_i32_8 = arith.constant 0 : i32
    %15 = arith.addi %4, %c0_i32_8 : i32
    %16 = arith.index_cast %15 : i32 to index
    %c2 = arith.constant 2 : index
    %c0_9 = arith.constant 0 : index
    %17 = vector.load %arg7[%16, %c2, %c0_9] : memref<18x18x4xf32, #tpu.memory_space<vmem>>, vector<8x16x4xf32>
    %18 = vector.shape_cast %17 : vector<8x16x4xf32> to vector<128x4xf32>
    %c0_10 = arith.constant 0 : index
    %c8 = arith.constant 8 : index
    %19 = vector.load %arg8[%c0_10, %c8] : memref<128x128xf32, #tpu.memory_space<vmem>>, vector<128x4xf32>
    tpu.vector_store %arg8[%c0_10, %c8], %18 {strides = array<i32>} : memref<128x128xf32, #tpu.memory_space<vmem>>, vector<128x4xf32>,
    %c1_i32 = arith.constant 1 : i32
    %20 = arith.addi %4, %c1_i32 : i32
    %21 = arith.index_cast %20 : i32 to index
    %c0_11 = arith.constant 0 : index
    %c0_12 = arith.constant 0 : index
    %22 = vector.load %arg7[%21, %c0_11, %c0_12] : memref<18x18x4xf32, #tpu.memory_space<vmem>>, vector<8x16x4xf32>
    %23 = vector.shape_cast %22 : vector<8x16x4xf32> to vector<128x4xf32>
    %c0_13 = arith.constant 0 : index
    %c12 = arith.constant 12 : index
    %24 = vector.load %arg8[%c0_13, %c12] : memref<128x128xf32, #tpu.memory_space<vmem>>, vector<128x4xf32>
    tpu.vector_store %arg8[%c0_13, %c12], %23 {strides = array<i32>} : memref<128x128xf32, #tpu.memory_space<vmem>>, vector<128x4xf32>,
    %c1_i32_14 = arith.constant 1 : i32
    %25 = arith.addi %4, %c1_i32_14 : i32
    %26 = arith.index_cast %25 : i32 to index
    %c1_15 = arith.constant 1 : index
    %c0_16 = arith.constant 0 : index
    %27 = vector.load %arg7[%26, %c1_15, %c0_16] : memref<18x18x4xf32, #tpu.memory_space<vmem>>, vector<8x16x4xf32>
    %28 = vector.shape_cast %27 : vector<8x16x4xf32> to vector<128x4xf32>
    %c0_17 = arith.constant 0 : index
    %c16 = arith.constant 16 : index
    %29 = vector.load %arg8[%c0_17, %c16] : memref<128x128xf32, #tpu.memory_space<vmem>>, vector<128x4xf32>
    tpu.vector_store %arg8[%c0_17, %c16], %28 {strides = array<i32>} : memref<128x128xf32, #tpu.memory_space<vmem>>, vector<128x4xf32>,
    %c1_i32_18 = arith.constant 1 : i32
    %30 = arith.addi %4, %c1_i32_18 : i32
    %31 = arith.index_cast %30 : i32 to index
    %c2_19 = arith.constant 2 : index
    %c0_20 = arith.constant 0 : index
    %32 = vector.load %arg7[%31, %c2_19, %c0_20] : memref<18x18x4xf32, #tpu.memory_space<vmem>>, vector<8x16x4xf32>
    %33 = vector.shape_cast %32 : vector<8x16x4xf32> to vector<128x4xf32>
    %c0_21 = arith.constant 0 : index
    %c20 = arith.constant 20 : index
    %34 = vector.load %arg8[%c0_21, %c20] : memref<128x128xf32, #tpu.memory_space<vmem>>, vector<128x4xf32>
    tpu.vector_store %arg8[%c0_21, %c20], %33 {strides = array<i32>} : memref<128x128xf32, #tpu.memory_space<vmem>>, vector<128x4xf32>,
    %c2_i32 = arith.constant 2 : i32
    %35 = arith.addi %4, %c2_i32 : i32
    %36 = arith.index_cast %35 : i32 to index
    %c0_22 = arith.constant 0 : index
    %c0_23 = arith.constant 0 : index
    %37 = vector.load %arg7[%36, %c0_22, %c0_23] : memref<18x18x4xf32, #tpu.memory_space<vmem>>, vector<8x16x4xf32>
    %38 = vector.shape_cast %37 : vector<8x16x4xf32> to vector<128x4xf32>
    %c0_24 = arith.constant 0 : index
    %c24 = arith.constant 24 : index
    %39 = vector.load %arg8[%c0_24, %c24] : memref<128x128xf32, #tpu.memory_space<vmem>>, vector<128x4xf32>
    tpu.vector_store %arg8[%c0_24, %c24], %38 {strides = array<i32>} : memref<128x128xf32, #tpu.memory_space<vmem>>, vector<128x4xf32>,
    %c2_i32_25 = arith.constant 2 : i32
    %40 = arith.addi %4, %c2_i32_25 : i32
    %41 = arith.index_cast %40 : i32 to index
    %c1_26 = arith.constant 1 : index
    %c0_27 = arith.constant 0 : index
    %42 = vector.load %arg7[%41, %c1_26, %c0_27] : memref<18x18x4xf32, #tpu.memory_space<vmem>>, vector<8x16x4xf32>
    %43 = vector.shape_cast %42 : vector<8x16x4xf32> to vector<128x4xf32>
    %c0_28 = arith.constant 0 : index
    %c28 = arith.constant 28 : index
    %44 = vector.load %arg8[%c0_28, %c28] : memref<128x128xf32, #tpu.memory_space<vmem>>, vector<128x4xf32>
    tpu.vector_store %arg8[%c0_28, %c28], %43 {strides = array<i32>} : memref<128x128xf32, #tpu.memory_space<vmem>>, vector<128x4xf32>,
    %c2_i32_29 = arith.constant 2 : i32
    %45 = arith.addi %4, %c2_i32_29 : i32
    %46 = arith.index_cast %45 : i32 to index
    %c2_30 = arith.constant 2 : index
    %c0_31 = arith.constant 0 : index
    %47 = vector.load %arg7[%46, %c2_30, %c0_31] : memref<18x18x4xf32, #tpu.memory_space<vmem>>, vector<8x16x4xf32>
    %48 = vector.shape_cast %47 : vector<8x16x4xf32> to vector<128x4xf32>
    %c0_32 = arith.constant 0 : index
    %c32 = arith.constant 32 : index
    %49 = vector.load %arg8[%c0_32, %c32] : memref<128x128xf32, #tpu.memory_space<vmem>>, vector<128x4xf32>
    tpu.vector_store %arg8[%c0_32, %c32], %48 {strides = array<i32>} : memref<128x128xf32, #tpu.memory_space<vmem>>, vector<128x4xf32>,
    %c0_33 = arith.constant 0 : index
    %c0_34 = arith.constant 0 : index
    %50 = vector.load %arg3[%c0_33, %c0_34] : memref<8x128xf32, #tpu.memory_space<vmem>>, vector<8x128xf32>
    %c0_35 = arith.constant 0 : index
    %c0_36 = arith.constant 0 : index
    %51 = vector.load %arg8[%c0_35, %c0_36] : memref<128x128xf32, #tpu.memory_space<vmem>>, vector<128x128xf32>
    %cst = arith.constant dense<0.000000e+00> : vector<8x128xf32>
    %52 = tpu.matmul %50, %51, %cst {dimension_numbers = #tpu.dot_dimension_numbers<[1], [1], [0], [0], [0, 0, 1, 0], [], []>} : vector<8x128xf32>, vector<128x128xf32>, vector<8x128xf32> -> vector<8x128xf32>
    %c0_37 = arith.constant 0 : index
    %c0_38 = arith.constant 0 : index
    %c0_39 = arith.constant 0 : index
    %53 = vector.load %arg4[%c0_37, %c0_38, %c0_39] : memref<1x8x128xf32, #tpu.memory_space<vmem>>, vector<1x8x128xf32>
    %54 = vector.shape_cast %53 : vector<1x8x128xf32> to vector<8x128xf32>
    %55 = vector.shape_cast %52 : vector<8x128xf32> to vector<1x8x128xf32>
    tpu.vector_store %arg4[%c0_37, %c0_38, %c0_39], %55 {strides = array<i32>} : memref<1x8x128xf32, #tpu.memory_space<vmem>>, vector<1x8x128xf32>,
    %c0_40 = arith.constant 0 : index
    %c0_41 = arith.constant 0 : index
    %c0_42 = arith.constant 0 : index
    %56 = vector.load %arg5[%c0_40, %c0_41, %c0_42] : memref<1x8x1xf32, #tpu.memory_space<vmem>>, vector<1x8x1xf32>
    %57 = vector.shape_cast %56 : vector<1x8x1xf32> to vector<8x1xf32>
    %cst_43 = arith.constant dense<0.000000e+00> : vector<8xf32>
    %58 = vector.multi_reduction <add>, %52, %cst_43 [1] : vector<8x128xf32> to vector<8xf32>
    %59 = vector.shape_cast %58 : vector<8xf32> to vector<8x1xf32>
    %60 = arith.addf %57, %59 : vector<8x1xf32>
    %c0_44 = arith.constant 0 : index
    %c0_45 = arith.constant 0 : index
    %c0_46 = arith.constant 0 : index
    %61 = vector.load %arg5[%c0_44, %c0_45, %c0_46] : memref<1x8x1xf32, #tpu.memory_space<vmem>>, vector<1x8x1xf32>
    %62 = vector.shape_cast %61 : vector<1x8x1xf32> to vector<8x1xf32>
    %63 = vector.shape_cast %60 : vector<8x1xf32> to vector<1x8x1xf32>
    tpu.vector_store %arg5[%c0_44, %c0_45, %c0_46], %63 {strides = array<i32>} : memref<1x8x1xf32, #tpu.memory_space<vmem>>, vector<1x8x1xf32>,
    %c0_47 = arith.constant 0 : index
    %c0_48 = arith.constant 0 : index
    %c0_49 = arith.constant 0 : index
    %64 = vector.load %arg6[%c0_47, %c0_48, %c0_49] : memref<1x8x1xf32, #tpu.memory_space<vmem>>, vector<1x8x1xf32>
    %65 = vector.shape_cast %64 : vector<1x8x1xf32> to vector<8x1xf32>
    %66 = arith.mulf %52, %52 : vector<8x128xf32>
    %cst_50 = arith.constant dense<0.000000e+00> : vector<8xf32>
    %67 = vector.multi_reduction <add>, %66, %cst_50 [1] : vector<8x128xf32> to vector<8xf32>
    %68 = vector.shape_cast %67 : vector<8xf32> to vector<8x1xf32>
    %69 = arith.addf %65, %68 : vector<8x1xf32>
    %c0_51 = arith.constant 0 : index
    %c0_52 = arith.constant 0 : index
    %c0_53 = arith.constant 0 : index
    %70 = vector.load %arg6[%c0_51, %c0_52, %c0_53] : memref<1x8x1xf32, #tpu.memory_space<vmem>>, vector<1x8x1xf32>
    %71 = vector.shape_cast %70 : vector<1x8x1xf32> to vector<8x1xf32>
    %72 = vector.shape_cast %69 : vector<8x1xf32> to vector<1x8x1xf32>
    tpu.vector_store %arg6[%c0_51, %c0_52, %c0_53], %72 {strides = array<i32>} : memref<1x8x1xf32, #tpu.memory_space<vmem>>, vector<1x8x1xf32>,
    return
  }
  func.func @transform_0(%arg0: i32, %arg1: i32) -> (i32, i32, i32, i32) {
    %c0_i32 = arith.constant 0 : i32
    %c0_i32_0 = arith.constant 0 : i32
    %c0_i32_1 = arith.constant 0 : i32
    %c0_i32_2 = arith.constant 0 : i32
    return %arg0, %c0_i32, %c0_i32_0, %c0_i32_1 : i32, i32, i32, i32
  }
  func.func @transform_1(%arg0: i32, %arg1: i32) -> (i32, i32) {
    %c0_i32 = arith.constant 0 : i32
    %c0_i32_0 = arith.constant 0 : i32
    %c0_i32_1 = arith.constant 0 : i32
    return %c0_i32, %c0_i32_0 : i32, i32
  }
  func.func @transform_2(%arg0: i32, %arg1: i32) -> (i32, i32, i32) {
    %c0_i32 = arith.constant 0 : i32
    %c0_i32_0 = arith.constant 0 : i32
    return %arg0, %c0_i32, %arg1 : i32, i32, i32
  }
  func.func @transform_3(%arg0: i32, %arg1: i32) -> (i32, i32, i32) {
    %c0_i32 = arith.constant 0 : i32
    %c0_i32_0 = arith.constant 0 : i32
    %c0_i32_1 = arith.constant 0 : i32
    return %arg0, %c0_i32, %c0_i32_0 : i32, i32, i32
  }
  func.func @transform_4(%arg0: i32, %arg1: i32) -> (i32, i32, i32) {
    %c0_i32 = arith.constant 0 : i32
    %c0_i32_0 = arith.constant 0 : i32
    %c0_i32_1 = arith.constant 0 : i32
    return %arg0, %c0_i32, %c0_i32_0 : i32, i32, i32
  }
}

module attributes {stable_mosaic.version = 11 : i64} {
  func.func @_bn_relu_kernel(%arg0: i32, %arg1: i32, %arg2: memref<1x8x128xf32, #tpu.memory_space<vmem>>, %arg3: memref<8x1xf32, #tpu.memory_space<vmem>>, %arg4: memref<8x1xf32, #tpu.memory_space<vmem>>, %arg5: memref<1x8x128xf32, #tpu.memory_space<vmem>>) attributes {dimension_semantics = [#tpu.dimension_semantics<parallel>, #tpu.dimension_semantics<parallel>], iteration_bounds = array<i64: 2, 2>, scalar_prefetch = 0 : i64, scratch_operands = 0 : i64, tpu.core_type = #tpu.core_type<tc>, window_params = [{transform_indices = @transform_0, window_bounds = array<i64: 1, 8, 128>}, {pipeline_mode = #tpu.pipeline_mode<synchronous>, transform_indices = @transform_1, window_bounds = array<i64: 8, 1>}, {pipeline_mode = #tpu.pipeline_mode<synchronous>, transform_indices = @transform_2, window_bounds = array<i64: 8, 1>}, {transform_indices = @transform_3, window_bounds = array<i64: 1, 8, 128>}]} {
    %c0 = arith.constant 0 : index
    %c0_0 = arith.constant 0 : index
    %c0_1 = arith.constant 0 : index
    %0 = vector.load %arg2[%c0, %c0_0, %c0_1] : memref<1x8x128xf32, #tpu.memory_space<vmem>>, vector<1x8x128xf32>
    %1 = vector.shape_cast %0 : vector<1x8x128xf32> to vector<8x128xf32>
    %c0_2 = arith.constant 0 : index
    %c0_3 = arith.constant 0 : index
    %2 = vector.load %arg3[%c0_2, %c0_3] : memref<8x1xf32, #tpu.memory_space<vmem>>, vector<8x1xf32>
    %3 = vector.broadcast %2 : vector<8x1xf32> to vector<8x128xf32>
    %4 = arith.mulf %1, %3 : vector<8x128xf32>
    %c0_4 = arith.constant 0 : index
    %c0_5 = arith.constant 0 : index
    %5 = vector.load %arg4[%c0_4, %c0_5] : memref<8x1xf32, #tpu.memory_space<vmem>>, vector<8x1xf32>
    %6 = vector.broadcast %5 : vector<8x1xf32> to vector<8x128xf32>
    %7 = arith.addf %4, %6 : vector<8x128xf32>
    %cst = arith.constant 0.000000e+00 : f32
    %8 = vector.broadcast %cst : f32 to vector<8x128xf32>
    %9 = arith.maximumf %7, %8 : vector<8x128xf32>
    %c0_6 = arith.constant 0 : index
    %c0_7 = arith.constant 0 : index
    %c0_8 = arith.constant 0 : index
    %10 = vector.load %arg5[%c0_6, %c0_7, %c0_8] : memref<1x8x128xf32, #tpu.memory_space<vmem>>, vector<1x8x128xf32>
    %11 = vector.shape_cast %10 : vector<1x8x128xf32> to vector<8x128xf32>
    %12 = vector.shape_cast %9 : vector<8x128xf32> to vector<1x8x128xf32>
    tpu.vector_store %arg5[%c0_6, %c0_7, %c0_8], %12 {strides = array<i32>} : memref<1x8x128xf32, #tpu.memory_space<vmem>>, vector<1x8x128xf32>,
    return
  }
  func.func @transform_0(%arg0: i32, %arg1: i32) -> (i32, i32, i32) {
    %c0_i32 = arith.constant 0 : i32
    %c0_i32_0 = arith.constant 0 : i32
    return %arg0, %c0_i32, %arg1 : i32, i32, i32
  }
  func.func @transform_1(%arg0: i32, %arg1: i32) -> (i32, i32) {
    %c0_i32 = arith.constant 0 : i32
    %c0_i32_0 = arith.constant 0 : i32
    %c0_i32_1 = arith.constant 0 : i32
    return %c0_i32, %c0_i32_0 : i32, i32
  }
  func.func @transform_2(%arg0: i32, %arg1: i32) -> (i32, i32) {
    %c0_i32 = arith.constant 0 : i32
    %c0_i32_0 = arith.constant 0 : i32
    %c0_i32_1 = arith.constant 0 : i32
    return %c0_i32, %c0_i32_0 : i32, i32
  }
  func.func @transform_3(%arg0: i32, %arg1: i32) -> (i32, i32, i32) {
    %c0_i32 = arith.constant 0 : i32
    %c0_i32_0 = arith.constant 0 : i32
    return %arg0, %c0_i32, %arg1 : i32, i32, i32
  }
}

</mosaic_0001>

<bundles_post_ra>
// kernel: depthwise_separable_conv.3
= control target key start
LH: loop header
LB: loop body
LE: loop exit
PB: predicated region body
PF: predicated region fallthrough
CT: control target
= control target key end

     0   :  { %s419_s12 = smov 0   ;;  %s421_s13 = smov 0   ;;  %s476_s0 = inlined_call_operand.vmem [shape: f32[2,8,256], index: 0, kind: input, shape index: {}]   ;;  %s477_s1 = inlined_call_operand.vmem [shape: f32[8,1], index: 1, kind: input, shape index: {}]   ;;  %s478_s2 = inlined_call_operand.vmem [shape: f32[8,1], index: 2, kind: input, shape index: {}]   ;;  %s479_s3 = inlined_call_operand.vmem [shape: f32[2,8,256], index: 3, kind: output, shape index: {}]  }
   0x1   :  { %s423_s14 = smov 0   ;;  %s425_s15 = smov 0  }
   0x2   :  { %s427_s16 = smov 0  }
   0x3 LB: > { %s22_s17 = sadd.s32 1, %s388_s14  ;;  %s25_s18 = sadd.s32 1, %s392_s15  ;;  %s396_s16 = sphi %s427_s16, %s13_s16   ;;  %s392_s15 = sphi %s425_s15, %s483_s15   ;;  %s388_s14 = sphi %s423_s14, %s482_s14   ;;  %s384_s13 = sphi %s421_s13, %s481_s13   ;;  %s380_s12 = sphi %s419_s12, %s480_s12  }
   0x4   : > { %p23_p0 = scmp.ge.s32.totalorder %s22_s17, 2  ;;  %p309_p1 = scmp.ge.s32.totalorder %s396_s16, 1 }
   0x5   : > { %p156_p2 = scmp.lt.s32.totalorder %s396_s16, 5 }
   0x6   : > { %s485_s17 = smov (%p23_p0, %s22_s17), 0  ;;  %s487_s18 = smov (!%p23_p0, %s25_s18), %s392_s15 }
   0x7   : > { %p157_p3 = pnand %p309_p1, %p156_p2  ;;  %p27_p4 = scmp.ge.s32.totalorder %s487_s18, 2 }
   0x8   : > { %v203_v0 = vld [vmem:[%s477_s1] sm:$0xff] (!%p157_p3)  ;;  %v398_v1 = vmov (!%p157_p3), 0   ;;  %p186_p5 = scmp.lt.s32.totalorder (!%p157_p3), %s384_s13, 1  ;;  %p188_p6 = scmp.lt.s32.totalorder (!%p157_p3), %s380_s12, 1 }
   0x9   : > { %s489_s18 = smov (%p27_p4, %s487_s18), 0  ;;  %160 = sbr.rel (%p157_p3) target bundleno = 148 (0x94), region = 32 }
   0xa   : > { %357 = vset.pattern.permute.xlu0 (!%p157_p3), %v398_v1  ;;  %v210_v2 = vld [vmem:[%s478_s2] sm:$0xff] (!%p157_p3) }
   0xb   : > { %206 = vperm.xlu0 (!%p157_p3), %357, %v203_v0  }
   0xf   : > { %213 = vperm.xlu0 (!%p157_p3), %357, %v210_v2  }
  0x10   : > { %s491_s13 = smov (!%p186_p5, %s384_s13), 1  ;;  %s493_s12 = smov (!%p188_p6, %s380_s12), 1 }
  0x11   : > { %s310_s23 = sshll.u32 %s491_s13, 1 }
  0x12   : > { %s191_s24 = sadd.s32 %s310_s23, %s493_s12 }
  0x13   : > { %s311_s25 = sshll.u32 %s191_s24, 3 }
  0x14   : > { %s193_s28 = scalar_lea.vmem %s476_s0, %s311_s25  ;;  %s201_s4 = scalar_lea.vmem %s479_s3, %s311_s25 }
  0x15   : > { %v202_v4 = vld [vmem:[%s193_s28] sm:$0xff] }
  0x8a   : > { %v207_v3 = vpop.permute.xlu0 %206 }
  0x8b   : > { %v209_v5 = vmul.f32 %v207_v3, %v202_v4 }
  0x8e   : > { %v214_v6 = vpop.permute.xlu0 %213 }
  0x8f   : > { %v216_v7 = vadd.f32 %v214_v6, %v209_v5 }
  0x91   : > { %v217_v8 = vmax.f32 %v216_v7, 0.0 }
  0x93   : > { %218 = vst [vmem:[%s201_s4] sm:$0xff] %v217_v8 }
  0x94 PF: > { %s13_s16 = sadd.s32 1, %s396_s16   ;;  %s480_s12 = smov %s388_s14 }
  0x95   : > { %p10_p7 = scmp.ge.s32.totalorder %s13_s16, 6   ;;  %s481_s13 = smov %s392_s15 }
  0x96   : > { %s482_s14 = smov %s485_s17  ;;  %s483_s15 = smov %s489_s18 }
  0x97   :  { %12 = sbr.rel (!%p10_p7) target bundleno = 3 (0x3), region = 62 }

// kernel: depthwise_separable_conv.2
= control target key start
LH: loop header
LB: loop body
LE: loop exit
PB: predicated region body
PF: predicated region fallthrough
CT: control target
= control target key end

     0   :  { %s1775_s15 = smov 0   ;;  %s1777_s16 = smov 0   ;;  %s2507_s0 = inlined_call_operand.vmem [shape: f32[2,16,16,4], index: 0, kind: input, shape index: {}]   ;;  %s2508_s1 = inlined_call_operand.vmem [shape: f32[8,128], index: 1, kind: input, shape index: {}]   ;;  %s2509_s2 = inlined_call_operand.vmem [shape: f32[2,8,256], index: 2, kind: output, shape index: {0}]   ;;  %s2510_s3 = inlined_call_operand.vmem [shape: f32[2,8,1], index: 3, kind: output, shape index: {1}]   ;;  %s2511_s4 = inlined_call_operand.vmem [shape: f32[2,8,1], index: 4, kind: output, shape index: {2}]  }
   0x1   :  { %s1779_s17 = smov 0   ;;  %s1781_s18 = smov 0  }
   0x2   :  { %s1783_s19 = smov 0  }
   0x3 LB: > { %s24_s20 = sadd.s32 1, %s1728_s17  ;;  %s27_s21 = sadd.s32 1, %s1732_s18  ;;  %s1736_s19 = sphi %s1783_s19, %s15_s19   ;;  %s1732_s18 = sphi %s1781_s18, %s2515_s18   ;;  %s1728_s17 = sphi %s1779_s17, %s2514_s17   ;;  %s1724_s16 = sphi %s1777_s16, %s2513_s16   ;;  %s1720_s15 = sphi %s1775_s15, %s2512_s15  }
   0x4   : > { %p25_p0 = scmp.ge.s32.totalorder %s24_s20, 2  ;;  %p1457_p1 = scmp.ge.s32.totalorder %s1736_s19, 1 }
   0x5   : > { %p181_p2 = scmp.lt.s32.totalorder %s1736_s19, 5 }
   0x6   : > { %s2517_s20 = smov (%p25_p0, %s24_s20), 0  ;;  %s2519_s21 = smov (!%p25_p0, %s27_s21), %s1732_s18 }
   0x7   : > { %p182_p3 = pnand %p1457_p1, %p181_p2  ;;  %p29_p4 = scmp.ge.s32.totalorder %s2519_s21, 2 }
   0x8   : > { %p218_p5 = scmp.lt.s32.totalorder (!%p182_p3), %s1724_s16, 1  ;;  %p225_p6 = scmp.lt.s32.totalorder (!%p182_p3), %s1720_s15, 1 }
   0x9   : > { %s2521_s21 = smov (%p29_p4, %s2519_s21), 0  ;;  %185 = sbr.rel (%p182_p3) target bundleno = 823 (0x337), region = 28 }
   0xa   : > { %p1464_p7 = scmp.ne.s32.totalorder (!%p182_p3), %s1720_s15, 0 }
  0x10   : > { %s2523_s16 = smov (!%p218_p5, %s1724_s16), 1  ;;  %242 = sbr.rel (%p1464_p7) target bundleno = 72 (0x48), region = 32 }
  0x11   : > { %s226_s22 = scalar_select %p225_p6, %s1720_s15, 1 }
  0x12   : > { %s1569_s23 = sshll.u32 %s2523_s16, 8  ;;  %s1460_s24 = sshll.u32 %s2523_s16, 1  ;;  %vm243_vm0 = vcmask (!%p1464_p7), 31744   ;;  %vm246_vm1 = vcmask (!%p1464_p7), 25600   ;;  %v1738_v3 = vmov (!%p1464_p7), 0.0   ;;  %vm380_vm2 = vcmask (!%p1464_p7), 7168  }
  0x13   : > { %s1812_s27 = scalar_lea.vmem %s2507_s0, %s1569_s23  ;;  %s228_s28 = sadd.s32 %s1460_s24, %s226_s22  ;;  %248 = vst.msk [vmem:[#allocation2 + $0x18] sm:$0xff] (!%p1464_p7), %vm243_vm0, %v1738_v3  ;;  %244 = vst.msk [vmem:[#allocation2] sm:$0xff] (!%p1464_p7), %vm243_vm0, %v1738_v3 }
  0x14   : > { %s1461_s29 = sshll.u32 %s228_s28, 3  ;;  %s1462_s30 = sshll.u32 %s2523_s16, 3  ;;  %v1831_v0 = vld [vmem:[%s1812_s27] sm:$0xff] (!%p1464_p7)  ;;  %v1834_v1 = vld [vmem:[%s1812_s27 + $0x8] sm:$0xff] (!%p1464_p7)  ;;  %v1837_v2 = vld [vmem:[%s1812_s27 + $0x10] sm:$0xff] (!%p1464_p7)  ;;  %245 = vst.msk [vmem:[#allocation2 + $0x8] sm:$0xff] (!%p1464_p7), %vm243_vm0, %v1738_v3 }
  0x15   : > { %s1817_s7 = scalar_lea.vmem %s2509_s2, %s1461_s29  ;;  %s1822_s10 = scalar_lea.vmem %s2510_s3, %s1462_s30  ;;  %249 = vst.msk [vmem:[#allocation2 + $0x20] sm:$0xff] (!%p1464_p7), %vm243_vm0, %v1738_v3  ;;  %251 = vst.msk [vmem:[#allocation2 + $0x30] sm:$0xff] (!%p1464_p7), %vm243_vm0, %v1738_v3  ;;  %v302_v4 = vld [vmem:[%s1812_s27 + $0x18] sm:$0xff] (!%p1464_p7)  ;;  %v303_v5 = vld [vmem:[%s1812_s27 + $0x20] sm:$0xff] (!%p1464_p7) }
  0x16   : > { %s1827_s13 = scalar_lea.vmem %s2511_s4, %s1462_s30  ;;  %252 = vst.msk [vmem:[#allocation2 + $0x38] sm:$0xff] (!%p1464_p7), %vm243_vm0, %v1738_v3  ;;  %254 = vst.msk [vmem:[#allocation2 + $0x48] sm:$0xff] (!%p1464_p7), %vm243_vm0, %v1738_v3  ;;  %v304_v6 = vld [vmem:[%s1812_s27 + $0x28] sm:$0xff] (!%p1464_p7)  ;;  %v305_v7 = vld [vmem:[%s1812_s27 + $0x30] sm:$0xff] (!%p1464_p7) }
  0x17   : > { %255 = vst.msk [vmem:[#allocation2 + $0x50] sm:$0xff] %vm243_vm0, %v1738_v3  ;;  %257 = vst.msk [vmem:[#allocation2 + $0x60] sm:$0xff] %vm243_vm0, %v1738_v3  ;;  %v306_v8 = vld [vmem:[%s1812_s27 + $0x38] sm:$0xff]  ;;  %v307_v9 = vld [vmem:[%s1812_s27 + $0x40] sm:$0xff] }
  0x18   : > { %258 = vst.msk [vmem:[#allocation2 + $0x68] sm:$0xff] %vm243_vm0, %v1738_v3  ;;  %260 = vst.msk [vmem:[#allocation2 + $0x78] sm:$0xff] %vm243_vm0, %v1738_v3  ;;  %v308_v10 = vld [vmem:[%s1812_s27 + $0x48] sm:$0xff]  ;;  %v309_v11 = vld [vmem:[%s1812_s27 + $0x50] sm:$0xff] }
  0x19   : > { %261 = vst.msk [vmem:[#allocation2 + $0x80] sm:$0xff] %vm243_vm0, %v1738_v3  ;;  %263 = vst.msk [vmem:[#allocation2 + $0x90] sm:$0xff] %vm243_vm0, %v1738_v3  ;;  %v310_v12 = vld [vmem:[%s1812_s27 + $0x58] sm:$0xff]  ;;  %v311_v13 = vld [vmem:[%s1812_s27 + $0x60] sm:$0xff] }
  0x1a   : > { %264 = vst.msk [vmem:[#allocation2 + $0x98] sm:$0xff] %vm243_vm0, %v1738_v3  ;;  %266 = vst.msk [vmem:[#allocation2 + $0xa8] sm:$0xff] %vm243_vm0, %v1738_v3  ;;  %v312_v14 = vld [vmem:[%s1812_s27 + $0x68] sm:$0xff]  ;;  %v313_v15 = vld [vmem:[%s1812_s27 + $0x70] sm:$0xff] }
  0x1b   : > { %267 = vst.msk [vmem:[#allocation2 + $0xb0] sm:$0xff] %vm243_vm0, %v1738_v3  ;;  %269 = vst.msk [vmem:[#allocation2 + $0xc0] sm:$0xff] %vm243_vm0, %v1738_v3  ;;  %v314_v16 = vld [vmem:[%s1812_s27 + $0x78] sm:$0xff]  ;;  %v315_v17 = vld [vmem:[%s1812_s27 + $0x80] sm:$0xff] }
  0x1c   : > { %270 = vst.msk [vmem:[#allocation2 + $0xc8] sm:$0xff] %vm243_vm0, %v1738_v3  ;;  %272 = vst.msk [vmem:[#allocation2 + $0xd8] sm:$0xff] %vm243_vm0, %v1738_v3  ;;  %v316_v18 = vld [vmem:[%s1812_s27 + $0x88] sm:$0xff]  ;;  %v317_v19 = vld [vmem:[%s1812_s27 + $0x90] sm:$0xff] }
  0x1d   : > { %273 = vst.msk [vmem:[#allocation2 + $0xe0] sm:$0xff] %vm243_vm0, %v1738_v3  ;;  %275 = vst.msk [vmem:[#allocation2 + $0xf0] sm:$0xff] %vm243_vm0, %v1738_v3  ;;  %v318_v20 = vld [vmem:[%s1812_s27 + $0x98] sm:$0xff]  ;;  %v319_v21 = vld [vmem:[%s1812_s27 + $0xa0] sm:$0xff] }
  0x1e   : > { %276 = vst.msk [vmem:[#allocation2 + $0xf8] sm:$0xff] %vm243_vm0, %v1738_v3  ;;  %278 = vst.msk [vmem:[#allocation2 + $0x108] sm:$0xff] %vm243_vm0, %v1738_v3  ;;  %v320_v22 = vld [vmem:[%s1812_s27 + $0xa8] sm:$0xff]  ;;  %v321_v23 = vld [vmem:[%s1812_s27 + $0xb0] sm:$0xff] }
  0x1f   : > { %279 = vst.msk [vmem:[#allocation2 + $0x110] sm:$0xff] %vm243_vm0, %v1738_v3  ;;  %281 = vst.msk [vmem:[#allocation2 + $0x120] sm:$0xff] %vm243_vm0, %v1738_v3  ;;  %v322_v24 = vld [vmem:[%s1812_s27 + $0xb8] sm:$0xff]  ;;  %v323_v25 = vld [vmem:[%s1812_s27 + $0xc0] sm:$0xff] }
  0x20   : > { %282 = vst.msk [vmem:[#allocation2 + $0x128] sm:$0xff] %vm243_vm0, %v1738_v3  ;;  %284 = vst.msk [vmem:[#allocation2 + $0x138] sm:$0xff] %vm243_vm0, %v1738_v3  ;;  %v324_v26 = vld [vmem:[%s1812_s27 + $0xc8] sm:$0xff]  ;;  %v325_v27 = vld [vmem:[%s1812_s27 + $0xd0] sm:$0xff] }
  0x21   : > { %285 = vst.msk [vmem:[#allocation2 + $0x140] sm:$0xff] %vm243_vm0, %v1738_v3  ;;  %287 = vst.msk [vmem:[#allocation2 + $0x150] sm:$0xff] %vm243_vm0, %v1738_v3  ;;  %v326_v28 = vld [vmem:[%s1812_s27 + $0xd8] sm:$0xff]  ;;  %v327_v29 = vld [vmem:[%s1812_s27 + $0xe0] sm:$0xff] }
  0x22   : > { %288 = vst.msk [vmem:[#allocation2 + $0x158] sm:$0xff] %vm243_vm0, %v1738_v3  ;;  %290 = vst.msk [vmem:[#allocation2 + $0x168] sm:$0xff] %vm243_vm0, %v1738_v3  ;;  %v328_v30 = vld [vmem:[%s1812_s27 + $0xe8] sm:$0xff]  ;;  %v329_v31 = vld [vmem:[%s1812_s27 + $0xf0] sm:$0xff] }
  0x23   : > { %291 = vst.msk [vmem:[#allocation2 + $0x170] sm:$0xff] %vm243_vm0, %v1738_v3  ;;  %293 = vst.msk [vmem:[#allocation2 + $0x180] sm:$0xff] %vm243_vm0, %v1738_v3  ;;  %v330_v32 = vld [vmem:[%s1812_s27 + $0xf8] sm:$0xff] }
  0x24   : > { %294 = vst.msk [vmem:[#allocation2 + $0x188] sm:$0xff] %vm243_vm0, %v1738_v3  ;;  %296 = vst.msk [vmem:[#allocation2 + $0x198] sm:$0xff] %vm243_vm0, %v1738_v3 }
  0x25   : > { %297 = vst.msk [vmem:[#allocation2 + $0x1a0] sm:$0xff] %vm243_vm0, %v1738_v3  ;;  %364 = vst [vmem:[#allocation3] sm:$0xff] %v1738_v3 }
  0x26   : > { %365 = vst [vmem:[#allocation3 + $0x8] sm:$0xff] %v1738_v3  ;;  %366 = vst [vmem:[#allocation3 + $0x10] sm:$0xff] %v1738_v3 }
  0x27   : > { %367 = vst [vmem:[#allocation3 + $0x18] sm:$0xff] %v1738_v3  ;;  %368 = vst [vmem:[#allocation3 + $0x20] sm:$0xff] %v1738_v3 }
  0x28   : > { %369 = vst [vmem:[#allocation3 + $0x28] sm:$0xff] %v1738_v3  ;;  %370 = vst [vmem:[#allocation3 + $0x30] sm:$0xff] %v1738_v3 }
  0x29   : > { %371 = vst [vmem:[#allocation3 + $0x38] sm:$0xff] %v1738_v3  ;;  %372 = vst [vmem:[#allocation3 + $0x40] sm:$0xff] %v1738_v3 }
  0x2a   : > { %373 = vst [vmem:[#allocation3 + $0x48] sm:$0xff] %v1738_v3  ;;  %374 = vst [vmem:[#allocation3 + $0x50] sm:$0xff] %v1738_v3 }
  0x2b   : > { %375 = vst [vmem:[#allocation3 + $0x58] sm:$0xff] %v1738_v3  ;;  %376 = vst [vmem:[#allocation3 + $0x60] sm:$0xff] %v1738_v3 }
  0x2c   : > { %377 = vst [vmem:[#allocation3 + $0x68] sm:$0xff] %v1738_v3  ;;  %378 = vst [vmem:[#allocation3 + $0x70] sm:$0xff] %v1738_v3 }
  0x2d   : > { %379 = vst [vmem:[#allocation3 + $0x78] sm:$0xff] %v1738_v3  ;;  %250 = vst.msk [vmem:[#allocation2 + $0x28] sm:$0x3] %vm246_vm1, %v1738_v3 }
  0x2e   : > { %247 = vst.msk [vmem:[#allocation2 + $0x10] sm:$0x3] %vm246_vm1, %v1738_v3  ;;  %253 = vst.msk [vmem:[#allocation2 + $0x40] sm:$0x3] %vm246_vm1, %v1738_v3 }
  0x2f   : > { %256 = vst.msk [vmem:[#allocation2 + $0x58] sm:$0x3] %vm246_vm1, %v1738_v3  ;;  %259 = vst.msk [vmem:[#allocation2 + $0x70] sm:$0x3] %vm246_vm1, %v1738_v3 }
  0x30   : > { %262 = vst.msk [vmem:[#allocation2 + $0x88] sm:$0x3] %vm246_vm1, %v1738_v3  ;;  %265 = vst.msk [vmem:[#allocation2 + $0xa0] sm:$0x3] %vm246_vm1, %v1738_v3 }
  0x31   : > { %268 = vst.msk [vmem:[#allocation2 + $0xb8] sm:$0x3] %vm246_vm1, %v1738_v3  ;;  %271 = vst.msk [vmem:[#allocation2 + $0xd0] sm:$0x3] %vm246_vm1, %v1738_v3 }
  0x32   : > { %274 = vst.msk [vmem:[#allocation2 + $0xe8] sm:$0x3] %vm246_vm1, %v1738_v3  ;;  %277 = vst.msk [vmem:[#allocation2 + $0x100] sm:$0x3] %vm246_vm1, %v1738_v3 }
  0x33   : > { %280 = vst.msk [vmem:[#allocation2 + $0x118] sm:$0x3] %vm246_vm1, %v1738_v3  ;;  %283 = vst.msk [vmem:[#allocation2 + $0x130] sm:$0x3] %vm246_vm1, %v1738_v3 }
  0x34   : > { %286 = vst.msk [vmem:[#allocation2 + $0x148] sm:$0x3] %vm246_vm1, %v1738_v3  ;;  %289 = vst.msk [vmem:[#allocation2 + $0x160] sm:$0x3] %vm246_vm1, %v1738_v3 }
  0x35   : > { %292 = vst.msk [vmem:[#allocation2 + $0x178] sm:$0x3] %vm246_vm1, %v1738_v3  ;;  %295 = vst.msk [vmem:[#allocation2 + $0x190] sm:$0x3] %vm246_vm1, %v1738_v3 }
  0x36   : > { %298 = vst.msk [vmem:[#allocation2 + $0x1a8] sm:$0x3] %vm246_vm1, %v1738_v3 }
  0x37   : > { %332 = vst.msk [vmem:[#allocation2 + $0x19] sm:$0xff] %vm243_vm0, %v1831_v0  ;;  %333 = vst.msk [vmem:[#allocation2 + $0x21] sm:$0xff] %vm243_vm0, %v1834_v1 }
  0x38   : > { %334 = vst.msk [vmem:[#allocation2 + $0x31] sm:$0xff] %vm243_vm0, %v1837_v2  ;;  %335 = vst.msk [vmem:[#allocation2 + $0x39] sm:$0xff] %vm243_vm0, %v302_v4 }
  0x39   : > { %336 = vst.msk [vmem:[#allocation2 + $0x49] sm:$0xff] %vm243_vm0, %v303_v5  ;;  %337 = vst.msk [vmem:[#allocation2 + $0x51] sm:$0xff] %vm243_vm0, %v304_v6 }
  0x3a   : > { %381 = vst.msk [vmem:[%s1822_s10] sm:$0xff] %vm380_vm2, %v1738_v3  ;;  %382 = vst.msk [vmem:[%s1827_s13] sm:$0xff] %vm380_vm2, %v1738_v3 }
  0x3b   : > { %338 = vst.msk [vmem:[#allocation2 + $0x61] sm:$0xff] %vm243_vm0, %v305_v7  ;;  %339 = vst.msk [vmem:[#allocation2 + $0x69] sm:$0xff] %vm243_vm0, %v306_v8 }
  0x3c   : > { %340 = vst.msk [vmem:[#allocation2 + $0x79] sm:$0xff] %vm243_vm0, %v307_v9  ;;  %341 = vst.msk [vmem:[#allocation2 + $0x81] sm:$0xff] %vm243_vm0, %v308_v10 }
  0x3d   : > { %342 = vst.msk [vmem:[#allocation2 + $0x91] sm:$0xff] %vm243_vm0, %v309_v11  ;;  %343 = vst.msk [vmem:[#allocation2 + $0x99] sm:$0xff] %vm243_vm0, %v310_v12 }
  0x3e   : > { %344 = vst.msk [vmem:[#allocation2 + $0xa9] sm:$0xff] %vm243_vm0, %v311_v13  ;;  %345 = vst.msk [vmem:[#allocation2 + $0xb1] sm:$0xff] %vm243_vm0, %v312_v14 }
  0x3f   : > { %346 = vst.msk [vmem:[#allocation2 + $0xc1] sm:$0xff] %vm243_vm0, %v313_v15  ;;  %347 = vst.msk [vmem:[#allocation2 + $0xc9] sm:$0xff] %vm243_vm0, %v314_v16 }
  0x40   : > { %348 = vst.msk [vmem:[#allocation2 + $0xd9] sm:$0xff] %vm243_vm0, %v315_v17  ;;  %349 = vst.msk [vmem:[#allocation2 + $0xe1] sm:$0xff] %vm243_vm0, %v316_v18 }
  0x41   : > { %350 = vst.msk [vmem:[#allocation2 + $0xf1] sm:$0xff] %vm243_vm0, %v317_v19  ;;  %351 = vst.msk [vmem:[#allocation2 + $0xf9] sm:$0xff] %vm243_vm0, %v318_v20 }
  0x42   : > { %352 = vst.msk [vmem:[#allocation2 + $0x109] sm:$0xff] %vm243_vm0, %v319_v21  ;;  %353 = vst.msk [vmem:[#allocation2 + $0x111] sm:$0xff] %vm243_vm0, %v320_v22 }
  0x43   : > { %354 = vst.msk [vmem:[#allocation2 + $0x121] sm:$0xff] %vm243_vm0, %v321_v23  ;;  %355 = vst.msk [vmem:[#allocation2 + $0x129] sm:$0xff] %vm243_vm0, %v322_v24 }
  0x44   : > { %356 = vst.msk [vmem:[#allocation2 + $0x139] sm:$0xff] %vm243_vm0, %v323_v25  ;;  %357 = vst.msk [vmem:[#allocation2 + $0x141] sm:$0xff] %vm243_vm0, %v324_v26 }
  0x45   : > { %358 = vst.msk [vmem:[#allocation2 + $0x151] sm:$0xff] %vm243_vm0, %v325_v27  ;;  %359 = vst.msk [vmem:[#allocation2 + $0x159] sm:$0xff] %vm243_vm0, %v326_v28 }
  0x46   : > { %360 = vst.msk [vmem:[#allocation2 + $0x169] sm:$0xff] %vm243_vm0, %v327_v29  ;;  %361 = vst.msk [vmem:[#allocation2 + $0x171] sm:$0xff] %vm243_vm0, %v328_v30 }
  0x47   : > { %362 = vst.msk [vmem:[#allocation2 + $0x181] sm:$0xff] %vm243_vm0, %v329_v31  ;;  %363 = vst.msk [vmem:[#allocation2 + $0x189] sm:$0xff] %vm243_vm0, %v330_v32 }
  0x48 PF: > { %s1466_s14 = smul.u32 192, %s1720_s15  ;;  %s1739_s22 = smov 8   ;;  %vm402_vm3 = vcmask 31744   ;;  %v1746_v59 = vmov 0.0|0.0   ;;  %vm499_vm4 = vcmask 64544   ;;  %vm596_vm5 = vcmask 97344  }
  0x49   : > { %s1740_s23 = smov 4   ;;  %s1741_s15 = smov 12   ;;  %1622 = vmatprep.subr.bf16.mxu0 %v1746_v59  ;;  %vm696_vm6 = vcmask 130144   ;;  %vm793_vm7 = vcmask 162944   ;;  %vm890_vm8 = vcmask 195744   ;;  %vm990_vm9 = vcmask 228544  }
  0x4a   : > { %s2032_s16 = scalar_lea.vmem [#allocation2], %s1466_s14  ;;  %s1742_s24 = smov 16   ;;  %vm1087_vm10 = vcmask 261344   ;;  %vm1184_vm11 = vcmask 294144   ;;  %vm1748_vm12 = vmmov 0   ;;  %vm1293_vm13 = vcmask 7168  }
  0x4b   : > { %s1743_s25 = smov 20   ;;  %s1744_s26 = smov 24  }
  0x4c   : > { %s1745_s27 = smov 28   ;;  %s1747_s28 = smov 32  }
  0x4e   : > { %v516_v33 = vld [vmem:[%s2032_s16 + $0x2] sm:$0xff]  ;;  %v517_v36 = vld [vmem:[%s2032_s16 + $0xa] sm:$0xff]  ;;  %v1469_v38 = vld [vmem:[%s2032_s16 + $0x18] sm:$0xff] }
  0x4f   : > { %v419_v34 = vld [vmem:[%s2032_s16 + $0x1] sm:$0xff]  ;;  %548 = vrot.lane.b32.xlu1 %v516_v33, %s1739_s22  ;;  %v420_v37 = vld [vmem:[%s2032_s16 + $0x9] sm:$0xff]  ;;  %v1520_v39 = vld [vmem:[%s2032_s16 + $0x38] sm:$0xff]  ;;  %405 = vst.msk [vmem:[#allocation3 + $0x10] sm:$0xff] %vm402_vm3, %v1469_v38 }
  0x50   : > { %451 = vrot.lane.b32.xlu0 %v419_v34, %s1740_s23  ;;  %v1470_v35 = vld [vmem:[%s2032_s16 + $0x20] sm:$0xff]  ;;  %v1519_v40 = vld [vmem:[%s2032_s16 + $0x30] sm:$0xff]  ;;  %408 = vst.msk [vmem:[#allocation3 + $0x28] sm:$0xff] %vm402_vm3, %v1520_v39  ;;  %v2054_v42 = vld [vmem:[%s2032_s16 + $0x48] sm:$0xff] }
  0x51   : > { %406 = vst.msk [vmem:[#allocation3 + $0x18] sm:$0xff] %vm402_vm3, %v1470_v35  ;;  %407 = vst.msk [vmem:[#allocation3 + $0x20] sm:$0xff] %vm402_vm3, %v1519_v40  ;;  %v2051_v41 = vld [vmem:[%s2032_s16 + $0x50] sm:$0xff]  ;;  %v2061_v43 = vld [vmem:[%s2032_s16 + $0x68] sm:$0xff] }
  0x52   : > { %410 = vst.msk [vmem:[#allocation3 + $0x38] sm:$0xff] %vm402_vm3, %v2051_v41  ;;  %409 = vst.msk [vmem:[#allocation3 + $0x30] sm:$0xff] %vm402_vm3, %v2054_v42  ;;  %v2064_v44 = vld [vmem:[%s2032_s16 + $0x60] sm:$0xff]  ;;  %v2080_v49 = vld [vmem:[%s2032_s16 + $0x78] sm:$0xff] }
  0x53   : > { %550 = vrot.lane.b32.xlu1 %v517_v36, %s1739_s22  ;;  %v1486_v45 = vld [vmem:[%s2032_s16 + $0x21] sm:$0xff]  ;;  %412 = vst.msk [vmem:[#allocation3 + $0x48] sm:$0xff] %vm402_vm3, %v2061_v43  ;;  %411 = vst.msk [vmem:[#allocation3 + $0x40] sm:$0xff] %vm402_vm3, %v2064_v44  ;;  %v1485_v46 = vld [vmem:[%s2032_s16 + $0x19] sm:$0xff] }
  0x54   : > { %453 = vrot.lane.b32.xlu0 %v420_v37, %s1740_s23  ;;  %v386_v47 = vld [vmem:[%s2032_s16] sm:$0xff]  ;;  %v387_v50 = vld [vmem:[%s2032_s16 + $0x8] sm:$0xff]  ;;  %413 = vst.msk [vmem:[#allocation3 + $0x50] sm:$0xff] %vm402_vm3, %v2080_v49  ;;  %v2095_v53 = vld [vmem:[%s2032_s16 + $0x98] sm:$0xff] }
  0x55   : > { %v2076_v48 = vld [vmem:[%s2032_s16 + $0x80] sm:$0xff]  ;;  %403 = vst.msk [vmem:[#allocation3] sm:$0xff] %vm402_vm3, %v386_v47  ;;  %404 = vst.msk [vmem:[#allocation3 + $0x8] sm:$0xff] %vm402_vm3, %v387_v50  ;;  %v2098_v54 = vld [vmem:[%s2032_s16 + $0x90] sm:$0xff] }
  0x56   : > { %414 = vst.msk [vmem:[#allocation3 + $0x58] sm:$0xff] %vm402_vm3, %v2076_v48  ;;  %v1502_v51 = vld [vmem:[%s2032_s16 + $0x22] sm:$0xff]  ;;  %v1501_v52 = vld [vmem:[%s2032_s16 + $0x1a] sm:$0xff]  ;;  %416 = vst.msk [vmem:[#allocation3 + $0x68] sm:$0xff] %vm402_vm3, %v2095_v53 }
  0x57   : > { %650 = vrot.lane.b32.xlu1 %v1470_v35, %s1741_s15  ;;  %415 = vst.msk [vmem:[#allocation3 + $0x60] sm:$0xff] %vm402_vm3, %v2098_v54  ;;  %v1536_v55 = vld [vmem:[%s2032_s16 + $0x39] sm:$0xff]  ;;  %v1535_v56 = vld [vmem:[%s2032_s16 + $0x31] sm:$0xff]  ;;  %v2129_v61 = vld [vmem:[%s2032_s16 + $0xa8] sm:$0xff] }
  0x58   : > { %648 = vrot.lane.b32.xlu0 %v1469_v38, %s1741_s15  ;;  %v1552_v57 = vld [vmem:[%s2032_s16 + $0x3a] sm:$0xff]  ;;  %v1551_v58 = vld [vmem:[%s2032_s16 + $0x32] sm:$0xff]  ;;  %417 = vst.msk [vmem:[#allocation3 + $0x70] sm:$0xff] %vm402_vm3, %v2129_v61  ;;  %v1537_v63 = vld [vmem:[%s2032_s16 + $0x49] sm:$0xff] }
  0x59   : > { %v2126_v60 = vld [vmem:[%s2032_s16 + $0xb0] sm:$0xff]  ;;  %v1539_v3 = vld [vmem:[%s2032_s16 + $0x61] sm:$0xff]  ;;  %v2193_v9 = vld [vmem:[%s2032_s16 + $0x79] sm:$0xff] }
  0x5a   : > { %418 = vst.msk [vmem:[#allocation3 + $0x78] sm:$0xff] %vm402_vm3, %v2126_v60  ;;  %v1538_v62 = vld [vmem:[%s2032_s16 + $0x51] sm:$0xff]  ;;  %v1540_v2 = vld [vmem:[%s2032_s16 + $0x69] sm:$0xff]  ;;  %v2190_v8 = vld [vmem:[%s2032_s16 + $0x81] sm:$0xff] }
  0x5b   : > { %747 = vrot.lane.b32.xlu1 %v1486_v45, %s1742_s24  ;;  %v1554_v0 = vld [vmem:[%s2032_s16 + $0x52] sm:$0xff]  ;;  %v1553_v1 = vld [vmem:[%s2032_s16 + $0x4a] sm:$0xff]  ;;  %v1555_v5 = vld [vmem:[%s2032_s16 + $0x62] sm:$0xff] }
  0x5c   : > { %745 = vrot.lane.b32.xlu0 %v1485_v46, %s1742_s24  ;;  %v1556_v4 = vld [vmem:[%s2032_s16 + $0x6a] sm:$0xff]  ;;  %v2202_v12 = vld [vmem:[%s2032_s16 + $0x82] sm:$0xff]  ;;  %v2205_v13 = vld [vmem:[%s2032_s16 + $0x7a] sm:$0xff] }
  0x5d   : > { %v2246_v28 = vld [vmem:[%s2032_s16 + $0x99] sm:$0xff]  ;;  %v2249_v29 = vld [vmem:[%s2032_s16 + $0x91] sm:$0xff] }
  0x5e   : > { %v2258_v35 = vld [vmem:[%s2032_s16 + $0x9a] sm:$0xff]  ;;  %v2261_v36 = vld [vmem:[%s2032_s16 + $0x92] sm:$0xff] }
  0x5f   : > { %844 = vrot.lane.b32.xlu1 %v1502_v51, %s1743_s25 }
  0x60   : > { %842 = vrot.lane.b32.xlu0 %v1501_v52, %s1743_s25 }
  0x63   : > { %944 = vrot.lane.b32.xlu1 %v1520_v39, %s1744_s26 }
  0x64   : > { %942 = vrot.lane.b32.xlu0 %v1519_v40, %s1744_s26 }
  0x67   : > { %1041 = vrot.lane.b32.xlu1 %v1536_v55, %s1745_s27 }
  0x68   : > { %1039 = vrot.lane.b32.xlu0 %v1535_v56, %s1745_s27 }
  0x6b   : > { %1138 = vrot.lane.b32.xlu1 %v1552_v57, %s1747_s28 }
  0x6c   : > { %1136 = vrot.lane.b32.xlu0 %v1551_v58, %s1747_s28 }
  0x6f   : > { %457 = vrot.lane.b32.xlu1 %v1486_v45, %s1740_s23 }
  0x70   : > { %455 = vrot.lane.b32.xlu0 %v1485_v46, %s1740_s23 }
  0x73   : > { %554 = vrot.lane.b32.xlu1 %v1502_v51, %s1739_s22  ;;  %v2307_v51 = vld [vmem:[%s2032_s16 + $0xb1] sm:$0xff] }
  0x74   : > { %552 = vrot.lane.b32.xlu0 %v1501_v52, %s1739_s22  ;;  %v2310_v52 = vld [vmem:[%s2032_s16 + $0xa9] sm:$0xff] }
  0x77   : > { %654 = vrot.lane.b32.xlu1 %v1520_v39, %s1741_s15 }
  0x78   : > { %652 = vrot.lane.b32.xlu0 %v1519_v40, %s1741_s15 }
  0x7b   : > { %751 = vrot.lane.b32.xlu1 %v1536_v55, %s1742_s24 }
  0x7c   : > { %749 = vrot.lane.b32.xlu0 %v1535_v56, %s1742_s24 }
  0x7f   : > { %848 = vrot.lane.b32.xlu1 %v1552_v57, %s1743_s25 }
  0x80   : > { %846 = vrot.lane.b32.xlu0 %v1551_v58, %s1743_s25 }
  0x83   : > { %948 = vrot.lane.b32.xlu1 %v2051_v41, %s1744_s26 }
  0x84   : > { %946 = vrot.lane.b32.xlu0 %v2054_v42, %s1744_s26 }
  0x87   : > { %1045 = vrot.lane.b32.xlu1 %v1538_v62, %s1745_s27 }
  0x88   : > { %1043 = vrot.lane.b32.xlu0 %v1537_v63, %s1745_s27 }
  0x8b   : > { %1142 = vrot.lane.b32.xlu1 %v1554_v0, %s1747_s28 }
  0x8c   : > { %1140 = vrot.lane.b32.xlu0 %v1553_v1, %s1747_s28 }
  0x8f   : > { %461 = vrot.lane.b32.xlu1 %v1536_v55, %s1740_s23 }
  0x90   : > { %459 = vrot.lane.b32.xlu0 %v1535_v56, %s1740_s23 }
  0x93   : > { %558 = vrot.lane.b32.xlu1 %v1552_v57, %s1739_s22 }
  0x94   : > { %556 = vrot.lane.b32.xlu0 %v1551_v58, %s1739_s22  ;;  %v2319_v58 = vld [vmem:[%s2032_s16 + $0xb2] sm:$0xff] }
  0x97   : > { %658 = vrot.lane.b32.xlu1 %v2051_v41, %s1741_s15 }
  0x98   : > { %656 = vrot.lane.b32.xlu0 %v2054_v42, %s1741_s15 }
  0x9b   : > { %755 = vrot.lane.b32.xlu1 %v1538_v62, %s1742_s24 }
  0x9c   : > { %753 = vrot.lane.b32.xlu0 %v1537_v63, %s1742_s24 }
  0x9f   : > { %852 = vrot.lane.b32.xlu1 %v1554_v0, %s1743_s25 }
  0xa0   : > { %850 = vrot.lane.b32.xlu0 %v1553_v1, %s1743_s25 }
  0xa3   : > { %952 = vrot.lane.b32.xlu1 %v2061_v43, %s1744_s26 }
  0xa4   : > { %950 = vrot.lane.b32.xlu0 %v2064_v44, %s1744_s26 }
  0xa7   : > { %1049 = vrot.lane.b32.xlu1 %v1540_v2, %s1745_s27 }
  0xa8   : > { %1047 = vrot.lane.b32.xlu0 %v1539_v3, %s1745_s27 }
  0xab   : > { %1146 = vrot.lane.b32.xlu1 %v1556_v4, %s1747_s28 }
  0xac   : > { %1144 = vrot.lane.b32.xlu0 %v1555_v5, %s1747_s28 }
  0xaf   : > { %465 = vrot.lane.b32.xlu1 %v1538_v62, %s1740_s23  ;;  %v2322_v62 = vld [vmem:[%s2032_s16 + $0xaa] sm:$0xff] }
  0xb0   : > { %463 = vrot.lane.b32.xlu0 %v1537_v63, %s1740_s23 }
  0xb3   : > { %562 = vrot.lane.b32.xlu1 %v1554_v0, %s1739_s22 }
  0xb4   : > { %560 = vrot.lane.b32.xlu0 %v1553_v1, %s1739_s22 }
  0xb7   : > { %662 = vrot.lane.b32.xlu1 %v2061_v43, %s1741_s15 }
  0xb8   : > { %660 = vrot.lane.b32.xlu0 %v2064_v44, %s1741_s15 }
  0xbb   : > { %759 = vrot.lane.b32.xlu1 %v1540_v2, %s1742_s24 }
  0xbc   : > { %757 = vrot.lane.b32.xlu0 %v1539_v3, %s1742_s24 }
  0xbf   : > { %856 = vrot.lane.b32.xlu1 %v1556_v4, %s1743_s25 }
  0xc0   : > { %854 = vrot.lane.b32.xlu0 %v1555_v5, %s1743_s25 }
  0xc1   : > { %v549_v6 = vpop.permute.xlu1 %548 }
  0xc2   : > { %v452_v7 = vpop.permute.xlu0 %451 }
  0xc3   : > { %500 = vst.msk [vmem:[#allocation3] sm:$0xff] %vm499_vm4, %v452_v7  ;;  %956 = vrot.lane.b32.xlu1 %v2076_v48, %s1744_s26 }
  0xc4   : > { %954 = vrot.lane.b32.xlu0 %v2080_v49, %s1744_s26  ;;  %597 = vst.msk [vmem:[#allocation3] sm:$0xff] %vm596_vm5, %v549_v6 }
  0xc5   : > { %v551_v10 = vpop.permute.xlu1 %550 }
  0xc6   : > { %v454_v11 = vpop.permute.xlu0 %453 }
  0xc7   : > { %501 = vst.msk [vmem:[#allocation3 + $0x8] sm:$0xff] %vm499_vm4, %v454_v11  ;;  %1053 = vrot.lane.b32.xlu1 %v2190_v8, %s1745_s27 }
  0xc8   : > { %1051 = vrot.lane.b32.xlu0 %v2193_v9, %s1745_s27  ;;  %598 = vst.msk [vmem:[#allocation3 + $0x8] sm:$0xff] %vm596_vm5, %v551_v10 }
  0xc9   : > { %v651_v14 = vpop.permute.xlu1 %650 }
  0xca   : > { %v649_v15 = vpop.permute.xlu0 %648  ;;  %698 = vst.msk [vmem:[#allocation3 + $0x8] sm:$0xff] %vm696_vm6, %v651_v14  ;;  %v1547_v14 = vld [vmem:[%s2032_s16 + $0xc1] sm:$0xff] }
  0xcb   : > { %697 = vst.msk [vmem:[#allocation3] sm:$0xff] %vm696_vm6, %v649_v15  ;;  %1150 = vrot.lane.b32.xlu1 %v2202_v12, %s1747_s28 }
  0xcc   : > { %1148 = vrot.lane.b32.xlu0 %v2205_v13, %s1747_s28 }
  0xcd   : > { %v748_v16 = vpop.permute.xlu1 %747 }
  0xce   : > { %v746_v17 = vpop.permute.xlu0 %745  ;;  %795 = vst.msk [vmem:[#allocation3 + $0x8] sm:$0xff] %vm793_vm7, %v748_v16 }
  0xcf   : > { %794 = vst.msk [vmem:[#allocation3] sm:$0xff] %vm793_vm7, %v746_v17  ;;  %469 = vrot.lane.b32.xlu1 %v1540_v2, %s1740_s23 }
  0xd0   : > { %467 = vrot.lane.b32.xlu0 %v1539_v3, %s1740_s23 }
  0xd1   : > { %v845_v18 = vpop.permute.xlu1 %844 }
  0xd2   : > { %v843_v19 = vpop.permute.xlu0 %842  ;;  %892 = vst.msk [vmem:[#allocation3 + $0x8] sm:$0xff] %vm890_vm8, %v845_v18 }
  0xd3   : > { %891 = vst.msk [vmem:[#allocation3] sm:$0xff] %vm890_vm8, %v843_v19  ;;  %566 = vrot.lane.b32.xlu1 %v1556_v4, %s1739_s22 }
  0xd4   : > { %564 = vrot.lane.b32.xlu0 %v1555_v5, %s1739_s22 }
  0xd5   : > { %v945_v20 = vpop.permute.xlu1 %944 }
  0xd6   : > { %v943_v21 = vpop.permute.xlu0 %942  ;;  %992 = vst.msk [vmem:[#allocation3 + $0x8] sm:$0xff] %vm990_vm9, %v945_v20  ;;  %v1564_v20 = vld [vmem:[%s2032_s16 + $0xca] sm:$0xff] }
  0xd7   : > { %991 = vst.msk [vmem:[#allocation3] sm:$0xff] %vm990_vm9, %v943_v21  ;;  %666 = vrot.lane.b32.xlu1 %v2076_v48, %s1741_s15  ;;  %v1563_v21 = vld [vmem:[%s2032_s16 + $0xc2] sm:$0xff] }
  0xd8   : > { %664 = vrot.lane.b32.xlu0 %v2080_v49, %s1741_s15 }
  0xd9   : > { %v1042_v22 = vpop.permute.xlu1 %1041 }
  0xda   : > { %v1040_v23 = vpop.permute.xlu0 %1039  ;;  %1089 = vst.msk [vmem:[#allocation3 + $0x8] sm:$0xff] %vm1087_vm10, %v1042_v22 }
  0xdb   : > { %1088 = vst.msk [vmem:[#allocation3] sm:$0xff] %vm1087_vm10, %v1040_v23  ;;  %763 = vrot.lane.b32.xlu1 %v2190_v8, %s1742_s24 }
  0xdc   : > { %761 = vrot.lane.b32.xlu0 %v2193_v9, %s1742_s24 }
  0xdd   : > { %v1139_v24 = vpop.permute.xlu1 %1138 }
  0xde   : > { %v1137_v25 = vpop.permute.xlu0 %1136  ;;  %1186 = vst.msk [vmem:[#allocation3 + $0x8] sm:$0xff] %vm1184_vm11, %v1139_v24 }
  0xdf   : > { %1185 = vst.msk [vmem:[#allocation3] sm:$0xff] %vm1184_vm11, %v1137_v25  ;;  %860 = vrot.lane.b32.xlu1 %v2202_v12, %s1743_s25 }
  0xe0   : > { %858 = vrot.lane.b32.xlu0 %v2205_v13, %s1743_s25 }
  0xe1   : > { %v458_v26 = vpop.permute.xlu1 %457 }
  0xe2   : > { %v456_v27 = vpop.permute.xlu0 %455  ;;  %503 = vst.msk [vmem:[#allocation3 + $0x18] sm:$0xff] %vm499_vm4, %v458_v26 }
  0xe3   : > { %502 = vst.msk [vmem:[#allocation3 + $0x10] sm:$0xff] %vm499_vm4, %v456_v27  ;;  %960 = vrot.lane.b32.xlu1 %v2095_v53, %s1744_s26 }
  0xe4   : > { %958 = vrot.lane.b32.xlu0 %v2098_v54, %s1744_s26 }
  0xe5   : > { %v555_v30 = vpop.permute.xlu1 %554  ;;  %v1203_v33 = vld [vmem:[#allocation3 + $0x8] sm:$0xff] }
  0xe6   : > { %v553_v31 = vpop.permute.xlu0 %552  ;;  %v1202_v32 = vld [vmem:[#allocation3] sm:$0xff]  ;;  %600 = vst.msk [vmem:[#allocation3 + $0x18] sm:$0xff] %vm596_vm5, %v555_v30 }
  0xe7   : > { %599 = vst.msk [vmem:[#allocation3 + $0x10] sm:$0xff] %vm596_vm5, %v553_v31  ;;  %v1623_v34 = vpack.c.bf16 %v1203_v33, %v1202_v32  ;;  %1057 = vrot.lane.b32.xlu1 %v2246_v28, %s1745_s27 }
  0xe8   : > { %1055 = vrot.lane.b32.xlu0 %v2249_v29, %s1745_s27 }
  0xe9   : > { %1624 = vmatpush3.bf16.xpose.msra.mxu0 %v1623_v34  ;;  %v655_v37 = vpop.permute.xlu1 %654  ;;  %v1534_v34 = vld [vmem:[%s2032_s16 + $0xe0] sm:$0xff] }
  0xea   : > { %v653_v38 = vpop.permute.xlu0 %652  ;;  %1625 = vmatprep.subr.bf16.mxu0 %v1746_v59  ;;  %700 = vst.msk [vmem:[#allocation3 + $0x18] sm:$0xff] %vm696_vm6, %v655_v37 }
  0xeb   : > { %699 = vst.msk [vmem:[#allocation3 + $0x10] sm:$0xff] %vm696_vm6, %v653_v38  ;;  %1154 = vrot.lane.b32.xlu1 %v2258_v35, %s1747_s28  ;;  %v1550_v38 = vld [vmem:[%s2032_s16 + $0xe1] sm:$0xff] }
  0xec   : > { %1152 = vrot.lane.b32.xlu0 %v2261_v36, %s1747_s28 }
  0xed   : > { %v752_v39 = vpop.permute.xlu1 %751 }
  0xee   : > { %v750_v40 = vpop.permute.xlu0 %749  ;;  %797 = vst.msk [vmem:[#allocation3 + $0x18] sm:$0xff] %vm793_vm7, %v752_v39  ;;  %v1549_v39 = vld [vmem:[%s2032_s16 + $0xd9] sm:$0xff] }
  0xef   : > { %796 = vst.msk [vmem:[#allocation3 + $0x10] sm:$0xff] %vm793_vm7, %v750_v40  ;;  %473 = vrot.lane.b32.xlu1 %v2190_v8, %s1740_s23 }
  0xf0   : > { %471 = vrot.lane.b32.xlu0 %v2193_v9, %s1740_s23 }
  0xf1   : > { %v849_v41 = vpop.permute.xlu1 %848 }
  0xf2   : > { %v847_v42 = vpop.permute.xlu0 %846  ;;  %894 = vst.msk [vmem:[#allocation3 + $0x18] sm:$0xff] %vm890_vm8, %v849_v41 }
  0xf3   : > { %893 = vst.msk [vmem:[#allocation3 + $0x10] sm:$0xff] %vm890_vm8, %v847_v42  ;;  %570 = vrot.lane.b32.xlu1 %v2202_v12, %s1739_s22 }
  0xf4   : > { %568 = vrot.lane.b32.xlu0 %v2205_v13, %s1739_s22  ;;  %v1548_v13 = vld [vmem:[%s2032_s16 + $0xc9] sm:$0xff] }
  0xf5   : > { %v949_v43 = vpop.permute.xlu1 %948 }
  0xf6   : > { %v947_v44 = vpop.permute.xlu0 %946  ;;  %994 = vst.msk [vmem:[#allocation3 + $0x18] sm:$0xff] %vm990_vm9, %v949_v43 }
  0xf7   : > { %993 = vst.msk [vmem:[#allocation3 + $0x10] sm:$0xff] %vm990_vm9, %v947_v44  ;;  %670 = vrot.lane.b32.xlu1 %v2095_v53, %s1741_s15 }
  0xf8   : > { %668 = vrot.lane.b32.xlu0 %v2098_v54, %s1741_s15 }
  0xf9   : > { %v1046_v45 = vpop.permute.xlu1 %1045 }
  0xfa   : > { %v1044_v46 = vpop.permute.xlu0 %1043  ;;  %1091 = vst.msk [vmem:[#allocation3 + $0x18] sm:$0xff] %vm1087_vm10, %v1046_v45  ;;  %v1566_v45 = vld [vmem:[%s2032_s16 + $0xe2] sm:$0xff] }
  0xfb   : > { %1090 = vst.msk [vmem:[#allocation3 + $0x10] sm:$0xff] %vm1087_vm10, %v1044_v46  ;;  %767 = vrot.lane.b32.xlu1 %v2246_v28, %s1742_s24  ;;  %v1565_v46 = vld [vmem:[%s2032_s16 + $0xda] sm:$0xff] }
  0xfc   : > { %765 = vrot.lane.b32.xlu0 %v2249_v29, %s1742_s24 }
  0xfd   : > { %v1143_v47 = vpop.permute.xlu1 %1142 }
  0xfe   : > { %v1141_v48 = vpop.permute.xlu0 %1140  ;;  %1188 = vst.msk [vmem:[#allocation3 + $0x18] sm:$0xff] %vm1184_vm11, %v1143_v47 }
  0xff   : > { %1187 = vst.msk [vmem:[#allocation3 + $0x10] sm:$0xff] %vm1184_vm11, %v1141_v48  ;;  %864 = vrot.lane.b32.xlu1 %v2258_v35, %s1743_s25 }
 0x100   : > { %862 = vrot.lane.b32.xlu0 %v2261_v36, %s1743_s25 }
 0x101   : > { %v462_v49 = vpop.permute.xlu1 %461 }
 0x102   : > { %v460_v50 = vpop.permute.xlu0 %459  ;;  %505 = vst.msk [vmem:[#allocation3 + $0x28] sm:$0xff] %vm499_vm4, %v462_v49  ;;  %v1749_v49 = vmov 0.0  }
 0x103   : > { %504 = vst.msk [vmem:[#allocation3 + $0x20] sm:$0xff] %vm499_vm4, %v460_v50  ;;  %964 = vrot.lane.b32.xlu1 %v2126_v60, %s1744_s26  ;;  %1619 = vmatprep.mubr.msk.f32.mxu0 %vm1748_vm12, %v1749_v49 }
 0x104   : > { %962 = vrot.lane.b32.xlu0 %v2129_v61, %s1744_s26 }
 0x105   : > { %v559_v53 = vpop.permute.xlu1 %558  ;;  %v1205_v56 = vld [vmem:[#allocation3 + $0x18] sm:$0xff] }
 0x106   : > { %v557_v54 = vpop.permute.xlu0 %556  ;;  %v1204_v55 = vld [vmem:[#allocation3 + $0x10] sm:$0xff]  ;;  %602 = vst.msk [vmem:[#allocation3 + $0x28] sm:$0xff] %vm596_vm5, %v559_v53 }
 0x107   : > { %601 = vst.msk [vmem:[#allocation3 + $0x20] sm:$0xff] %vm596_vm5, %v557_v54  ;;  %v1626_v57 = vpack.c.bf16 %v1205_v56, %v1204_v55  ;;  %1061 = vrot.lane.b32.xlu1 %v2307_v51, %s1745_s27 }
 0x108   : > { %1059 = vrot.lane.b32.xlu0 %v2310_v52, %s1745_s27 }
 0x109   : > { %1627 = vmatpush3.bf16.xpose.msra.mxu0 %v1626_v57  ;;  %v659_v63 = vpop.permute.xlu1 %658 }
 0x10a   : > { %v657_v0 = vpop.permute.xlu0 %656  ;;  %1628 = vmatprep.subr.bf16.mxu0 %v1746_v59  ;;  %702 = vst.msk [vmem:[#allocation3 + $0x28] sm:$0xff] %vm696_vm6, %v659_v63 }
 0x10b   : > { %701 = vst.msk [vmem:[#allocation3 + $0x20] sm:$0xff] %vm696_vm6, %v657_v0  ;;  %1158 = vrot.lane.b32.xlu1 %v2319_v58, %s1747_s28 }
 0x10c   : > { %1156 = vrot.lane.b32.xlu0 %v2322_v62, %s1747_s28 }
 0x10d   : > { %v756_v1 = vpop.permute.xlu1 %755 }
 0x10e   : > { %v754_v2 = vpop.permute.xlu0 %753  ;;  %799 = vst.msk [vmem:[#allocation3 + $0x28] sm:$0xff] %vm793_vm7, %v756_v1 }
 0x10f   : > { %798 = vst.msk [vmem:[#allocation3 + $0x20] sm:$0xff] %vm793_vm7, %v754_v2  ;;  %477 = vrot.lane.b32.xlu1 %v2246_v28, %s1740_s23 }
 0x110   : > { %475 = vrot.lane.b32.xlu0 %v2249_v29, %s1740_s23 }
 0x111   : > { %v853_v3 = vpop.permute.xlu1 %852 }
 0x112   : > { %v851_v4 = vpop.permute.xlu0 %850  ;;  %896 = vst.msk [vmem:[#allocation3 + $0x28] sm:$0xff] %vm890_vm8, %v853_v3 }
 0x113   : > { %895 = vst.msk [vmem:[#allocation3 + $0x20] sm:$0xff] %vm890_vm8, %v851_v4  ;;  %574 = vrot.lane.b32.xlu1 %v2258_v35, %s1739_s22  ;;  %v1533_v35 = vld [vmem:[%s2032_s16 + $0xd8] sm:$0xff] }
 0x114   : > { %572 = vrot.lane.b32.xlu0 %v2261_v36, %s1739_s22 }
 0x115   : > { %v953_v5 = vpop.permute.xlu1 %952 }
 0x116   : > { %v951_v6 = vpop.permute.xlu0 %950  ;;  %996 = vst.msk [vmem:[#allocation3 + $0x28] sm:$0xff] %vm990_vm9, %v953_v5 }
 0x117   : > { %995 = vst.msk [vmem:[#allocation3 + $0x20] sm:$0xff] %vm990_vm9, %v951_v6  ;;  %674 = vrot.lane.b32.xlu1 %v2126_v60, %s1741_s15  ;;  %v1532_v60 = vld [vmem:[%s2032_s16 + $0xc8] sm:$0xff] }
 0x118   : > { %672 = vrot.lane.b32.xlu0 %v2129_v61, %s1741_s15  ;;  %v1531_v61 = vld [vmem:[%s2032_s16 + $0xc0] sm:$0xff] }
 0x119   : > { %v1050_v7 = vpop.permute.xlu1 %1049 }
 0x11a   : > { %v1048_v8 = vpop.permute.xlu0 %1047  ;;  %1093 = vst.msk [vmem:[#allocation3 + $0x28] sm:$0xff] %vm1087_vm10, %v1050_v7 }
 0x11b   : > { %1092 = vst.msk [vmem:[#allocation3 + $0x20] sm:$0xff] %vm1087_vm10, %v1048_v8  ;;  %771 = vrot.lane.b32.xlu1 %v2307_v51, %s1742_s24 }
 0x11c   : > { %769 = vrot.lane.b32.xlu0 %v2310_v52, %s1742_s24 }
 0x11d   : > { %v1147_v9 = vpop.permute.xlu1 %1146 }
 0x11e   : > { %v1145_v10 = vpop.permute.xlu0 %1144  ;;  %1190 = vst.msk [vmem:[#allocation3 + $0x28] sm:$0xff] %vm1184_vm11, %v1147_v9 }
 0x11f   : > { %1189 = vst.msk [vmem:[#allocation3 + $0x20] sm:$0xff] %vm1184_vm11, %v1145_v10  ;;  %868 = vrot.lane.b32.xlu1 %v2319_v58, %s1743_s25 }
 0x120   : > { %866 = vrot.lane.b32.xlu0 %v2322_v62, %s1743_s25 }
 0x121   : > { %v466_v11 = vpop.permute.xlu1 %465 }
 0x122   : > { %v464_v12 = vpop.permute.xlu0 %463  ;;  %507 = vst.msk [vmem:[#allocation3 + $0x38] sm:$0xff] %vm499_vm4, %v466_v11 }
 0x123   : > { %506 = vst.msk [vmem:[#allocation3 + $0x30] sm:$0xff] %vm499_vm4, %v464_v12  ;;  %968 = vrot.lane.b32.xlu1 %v1532_v60, %s1744_s26 }
 0x124   : > { %966 = vrot.lane.b32.xlu0 %v1531_v61, %s1744_s26 }
 0x125   : > { %v563_v15 = vpop.permute.xlu1 %562  ;;  %v1207_v18 = vld [vmem:[#allocation3 + $0x28] sm:$0xff] }
 0x126   : > { %v561_v16 = vpop.permute.xlu0 %560  ;;  %v1206_v17 = vld [vmem:[#allocation3 + $0x20] sm:$0xff]  ;;  %604 = vst.msk [vmem:[#allocation3 + $0x38] sm:$0xff] %vm596_vm5, %v563_v15 }
 0x127   : > { %603 = vst.msk [vmem:[#allocation3 + $0x30] sm:$0xff] %vm596_vm5, %v561_v16  ;;  %v1629_v19 = vpack.c.bf16 %v1207_v18, %v1206_v17  ;;  %1065 = vrot.lane.b32.xlu1 %v1548_v13, %s1745_s27 }
 0x128   : > { %1063 = vrot.lane.b32.xlu0 %v1547_v14, %s1745_s27 }
 0x129   : > { %1630 = vmatpush3.bf16.xpose.msra.mxu0 %v1629_v19  ;;  %v663_v22 = vpop.permute.xlu1 %662 }
 0x12a   : > { %v661_v23 = vpop.permute.xlu0 %660  ;;  %1631 = vmatprep.subr.bf16.mxu0 %v1746_v59  ;;  %704 = vst.msk [vmem:[#allocation3 + $0x38] sm:$0xff] %vm696_vm6, %v663_v22 }
 0x12b   : > { %703 = vst.msk [vmem:[#allocation3 + $0x30] sm:$0xff] %vm696_vm6, %v661_v23  ;;  %1162 = vrot.lane.b32.xlu1 %v1564_v20, %s1747_s28 }
 0x12c   : > { %1160 = vrot.lane.b32.xlu0 %v1563_v21, %s1747_s28 }
 0x12d   : > { %v760_v24 = vpop.permute.xlu1 %759 }
 0x12e   : > { %v758_v25 = vpop.permute.xlu0 %757  ;;  %801 = vst.msk [vmem:[#allocation3 + $0x38] sm:$0xff] %vm793_vm7, %v760_v24 }
 0x12f   : > { %800 = vst.msk [vmem:[#allocation3 + $0x30] sm:$0xff] %vm793_vm7, %v758_v25  ;;  %481 = vrot.lane.b32.xlu1 %v2307_v51, %s1740_s23 }
 0x130   : > { %479 = vrot.lane.b32.xlu0 %v2310_v52, %s1740_s23 }
 0x131   : > { %v857_v26 = vpop.permute.xlu1 %856 }
 0x132   : > { %v855_v27 = vpop.permute.xlu0 %854  ;;  %898 = vst.msk [vmem:[#allocation3 + $0x38] sm:$0xff] %vm890_vm8, %v857_v26 }
 0x133   : > { %897 = vst.msk [vmem:[#allocation3 + $0x30] sm:$0xff] %vm890_vm8, %v855_v27  ;;  %578 = vrot.lane.b32.xlu1 %v2319_v58, %s1739_s22 }
 0x134   : > { %576 = vrot.lane.b32.xlu0 %v2322_v62, %s1739_s22 }
 0x135   : > { %v957_v28 = vpop.permute.xlu1 %956 }
 0x136   : > { %v955_v29 = vpop.permute.xlu0 %954  ;;  %998 = vst.msk [vmem:[#allocation3 + $0x38] sm:$0xff] %vm990_vm9, %v957_v28 }
 0x137   : > { %997 = vst.msk [vmem:[#allocation3 + $0x30] sm:$0xff] %vm990_vm9, %v955_v29  ;;  %678 = vrot.lane.b32.xlu1 %v1532_v60, %s1741_s15 }
 0x138   : > { %676 = vrot.lane.b32.xlu0 %v1531_v61, %s1741_s15 }
 0x139   : > { %v1054_v30 = vpop.permute.xlu1 %1053 }
 0x13a   : > { %v1052_v31 = vpop.permute.xlu0 %1051  ;;  %1095 = vst.msk [vmem:[#allocation3 + $0x38] sm:$0xff] %vm1087_vm10, %v1054_v30 }
 0x13b   : > { %1094 = vst.msk [vmem:[#allocation3 + $0x30] sm:$0xff] %vm1087_vm10, %v1052_v31  ;;  %775 = vrot.lane.b32.xlu1 %v1548_v13, %s1742_s24 }
 0x13c   : > { %773 = vrot.lane.b32.xlu0 %v1547_v14, %s1742_s24 }
 0x13d   : > { %v1151_v32 = vpop.permute.xlu1 %1150 }
 0x13e   : > { %v1149_v33 = vpop.permute.xlu0 %1148  ;;  %1192 = vst.msk [vmem:[#allocation3 + $0x38] sm:$0xff] %vm1184_vm11, %v1151_v32 }
 0x13f   : > { %1191 = vst.msk [vmem:[#allocation3 + $0x30] sm:$0xff] %vm1184_vm11, %v1149_v33  ;;  %872 = vrot.lane.b32.xlu1 %v1564_v20, %s1743_s25 }
 0x140   : > { %870 = vrot.lane.b32.xlu0 %v1563_v21, %s1743_s25 }
 0x141   : > { %v470_v36 = vpop.permute.xlu1 %469 }
 0x142   : > { %v468_v37 = vpop.permute.xlu0 %467  ;;  %509 = vst.msk [vmem:[#allocation3 + $0x48] sm:$0xff] %vm499_vm4, %v470_v36 }
 0x143   : > { %508 = vst.msk [vmem:[#allocation3 + $0x40] sm:$0xff] %vm499_vm4, %v468_v37  ;;  %972 = vrot.lane.b32.xlu1 %v1534_v34, %s1744_s26 }
 0x144   : > { %970 = vrot.lane.b32.xlu0 %v1533_v35, %s1744_s26 }
 0x145   : > { %v567_v40 = vpop.permute.xlu1 %566  ;;  %v1209_v43 = vld [vmem:[#allocation3 + $0x38] sm:$0xff] }
 0x146   : > { %v565_v41 = vpop.permute.xlu0 %564  ;;  %v1208_v42 = vld [vmem:[#allocation3 + $0x30] sm:$0xff]  ;;  %606 = vst.msk [vmem:[#allocation3 + $0x48] sm:$0xff] %vm596_vm5, %v567_v40 }
 0x147   : > { %605 = vst.msk [vmem:[#allocation3 + $0x40] sm:$0xff] %vm596_vm5, %v565_v41  ;;  %v1632_v44 = vpack.c.bf16 %v1209_v43, %v1208_v42  ;;  %1069 = vrot.lane.b32.xlu1 %v1550_v38, %s1745_s27 }
 0x148   : > { %1067 = vrot.lane.b32.xlu0 %v1549_v39, %s1745_s27 }
 0x149   : > { %1633 = vmatpush3.bf16.xpose.msra.mxu0 %v1632_v44  ;;  %v667_v47 = vpop.permute.xlu1 %666 }
 0x14a   : > { %v665_v48 = vpop.permute.xlu0 %664  ;;  %1634 = vmatprep.subr.bf16.mxu0 %v1746_v59  ;;  %706 = vst.msk [vmem:[#allocation3 + $0x48] sm:$0xff] %vm696_vm6, %v667_v47 }
 0x14b   : > { %705 = vst.msk [vmem:[#allocation3 + $0x40] sm:$0xff] %vm696_vm6, %v665_v48  ;;  %1166 = vrot.lane.b32.xlu1 %v1566_v45, %s1747_s28 }
 0x14c   : > { %1164 = vrot.lane.b32.xlu0 %v1565_v46, %s1747_s28 }
 0x14d   : > { %v764_v50 = vpop.permute.xlu1 %763 }
 0x14e   : > { %v762_v51 = vpop.permute.xlu0 %761  ;;  %803 = vst.msk [vmem:[#allocation3 + $0x48] sm:$0xff] %vm793_vm7, %v764_v50 }
 0x14f   : > { %802 = vst.msk [vmem:[#allocation3 + $0x40] sm:$0xff] %vm793_vm7, %v762_v51 }
 0x151   : > { %v861_v52 = vpop.permute.xlu1 %860 }
 0x152   : > { %v859_v53 = vpop.permute.xlu0 %858  ;;  %900 = vst.msk [vmem:[#allocation3 + $0x48] sm:$0xff] %vm890_vm8, %v861_v52 }
 0x153   : > { %899 = vst.msk [vmem:[#allocation3 + $0x40] sm:$0xff] %vm890_vm8, %v859_v53 }
 0x155   : > { %v961_v54 = vpop.permute.xlu1 %960 }
 0x156   : > { %v959_v55 = vpop.permute.xlu0 %958  ;;  %1000 = vst.msk [vmem:[#allocation3 + $0x48] sm:$0xff] %vm990_vm9, %v961_v54 }
 0x157   : > { %999 = vst.msk [vmem:[#allocation3 + $0x40] sm:$0xff] %vm990_vm9, %v959_v55 }
 0x159   : > { %v1058_v56 = vpop.permute.xlu1 %1057 }
 0x15a   : > { %v1056_v57 = vpop.permute.xlu0 %1055  ;;  %1097 = vst.msk [vmem:[#allocation3 + $0x48] sm:$0xff] %vm1087_vm10, %v1058_v56  ;;  %v1201_v56 = vld [vmem:[%s2508_s1] sm:$0xff] }
 0x15b   : > { %1096 = vst.msk [vmem:[#allocation3 + $0x40] sm:$0xff] %vm1087_vm10, %v1056_v57 }
 0x15d   : > { %v1155_v58 = vpop.permute.xlu1 %1154 }
 0x15e   : > { %v1153_v62 = vpop.permute.xlu0 %1152  ;;  %1194 = vst.msk [vmem:[#allocation3 + $0x48] sm:$0xff] %vm1184_vm11, %v1155_v58 }
 0x15f   : > { %1193 = vst.msk [vmem:[#allocation3 + $0x40] sm:$0xff] %vm1184_vm11, %v1153_v62 }
 0x161   : > { %v474_v63 = vpop.permute.xlu1 %473 }
 0x162   : > { %v472_v0 = vpop.permute.xlu0 %471  ;;  %511 = vst.msk [vmem:[#allocation3 + $0x58] sm:$0xff] %vm499_vm4, %v474_v63  ;;  %v1289_v63 = vld [vmem:[%s1822_s10] sm:$0xff] }
 0x163   : > { %510 = vst.msk [vmem:[#allocation3 + $0x50] sm:$0xff] %vm499_vm4, %v472_v0 }
 0x165   : > { %v571_v1 = vpop.permute.xlu1 %570  ;;  %v1211_v4 = vld [vmem:[#allocation3 + $0x48] sm:$0xff] }
 0x166   : > { %v569_v2 = vpop.permute.xlu0 %568  ;;  %v1210_v3 = vld [vmem:[#allocation3 + $0x40] sm:$0xff]  ;;  %608 = vst.msk [vmem:[#allocation3 + $0x58] sm:$0xff] %vm596_vm5, %v571_v1  ;;  %v1295_v1 = vld [vmem:[%s1827_s13] sm:$0xff] }
 0x167   : > { %607 = vst.msk [vmem:[#allocation3 + $0x50] sm:$0xff] %vm596_vm5, %v569_v2  ;;  %v1635_v5 = vpack.c.bf16 %v1211_v4, %v1210_v3 }
 0x169   : > { %1636 = vmatpush3.bf16.xpose.msra.mxu0 %v1635_v5  ;;  %v671_v6 = vpop.permute.xlu1 %670 }
 0x16a   : > { %v669_v7 = vpop.permute.xlu0 %668  ;;  %1637 = vmatprep.subr.bf16.mxu0 %v1746_v59  ;;  %708 = vst.msk [vmem:[#allocation3 + $0x58] sm:$0xff] %vm696_vm6, %v671_v6 }
 0x16b   : > { %707 = vst.msk [vmem:[#allocation3 + $0x50] sm:$0xff] %vm696_vm6, %v669_v7 }
 0x16d   : > { %v768_v8 = vpop.permute.xlu1 %767 }
 0x16e   : > { %v766_v9 = vpop.permute.xlu0 %765  ;;  %805 = vst.msk [vmem:[#allocation3 + $0x58] sm:$0xff] %vm793_vm7, %v768_v8 }
 0x16f   : > { %804 = vst.msk [vmem:[#allocation3 + $0x50] sm:$0xff] %vm793_vm7, %v766_v9 }
 0x171   : > { %v865_v10 = vpop.permute.xlu1 %864 }
 0x172   : > { %v863_v60 = vpop.permute.xlu0 %862  ;;  %902 = vst.msk [vmem:[#allocation3 + $0x58] sm:$0xff] %vm890_vm8, %v865_v10 }
 0x173   : > { %901 = vst.msk [vmem:[#allocation3 + $0x50] sm:$0xff] %vm890_vm8, %v863_v60 }
 0x175   : > { %v965_v61 = vpop.permute.xlu1 %964 }
 0x176   : > { %v963_v11 = vpop.permute.xlu0 %962  ;;  %1002 = vst.msk [vmem:[#allocation3 + $0x58] sm:$0xff] %vm990_vm9, %v965_v61 }
 0x177   : > { %1001 = vst.msk [vmem:[#allocation3 + $0x50] sm:$0xff] %vm990_vm9, %v963_v11 }
 0x179   : > { %v1062_v12 = vpop.permute.xlu1 %1061 }
 0x17a   : > { %v1060_v13 = vpop.permute.xlu0 %1059  ;;  %1099 = vst.msk [vmem:[#allocation3 + $0x58] sm:$0xff] %vm1087_vm10, %v1062_v12 }
 0x17b   : > { %1098 = vst.msk [vmem:[#allocation3 + $0x50] sm:$0xff] %vm1087_vm10, %v1060_v13 }
 0x17d   : > { %v1159_v14 = vpop.permute.xlu1 %1158 }
 0x17e   : > { %v1157_v15 = vpop.permute.xlu0 %1156  ;;  %1196 = vst.msk [vmem:[#allocation3 + $0x58] sm:$0xff] %vm1184_vm11, %v1159_v14 }
 0x17f   : > { %1195 = vst.msk [vmem:[#allocation3 + $0x50] sm:$0xff] %vm1184_vm11, %v1157_v15 }
 0x181   : > { %v478_v16 = vpop.permute.xlu1 %477 }
 0x182   : > { %v476_v17 = vpop.permute.xlu0 %475  ;;  %513 = vst.msk [vmem:[#allocation3 + $0x68] sm:$0xff] %vm499_vm4, %v478_v16 }
 0x183   : > { %512 = vst.msk [vmem:[#allocation3 + $0x60] sm:$0xff] %vm499_vm4, %v476_v17 }
 0x185   : > { %v575_v18 = vpop.permute.xlu1 %574  ;;  %v1213_v21 = vld [vmem:[#allocation3 + $0x58] sm:$0xff] }
 0x186   : > { %v573_v19 = vpop.permute.xlu0 %572  ;;  %v1212_v20 = vld [vmem:[#allocation3 + $0x50] sm:$0xff]  ;;  %610 = vst.msk [vmem:[#allocation3 + $0x68] sm:$0xff] %vm596_vm5, %v575_v18 }
 0x187   : > { %609 = vst.msk [vmem:[#allocation3 + $0x60] sm:$0xff] %vm596_vm5, %v573_v19  ;;  %v1638_v22 = vpack.c.bf16 %v1213_v21, %v1212_v20 }
 0x189   : > { %1639 = vmatpush3.bf16.xpose.msra.mxu0 %v1638_v22  ;;  %v675_v23 = vpop.permute.xlu1 %674 }
 0x18a   : > { %v673_v24 = vpop.permute.xlu0 %672  ;;  %1640 = vmatprep.subr.bf16.mxu0 %v1746_v59  ;;  %710 = vst.msk [vmem:[#allocation3 + $0x68] sm:$0xff] %vm696_vm6, %v675_v23 }
 0x18b   : > { %709 = vst.msk [vmem:[#allocation3 + $0x60] sm:$0xff] %vm696_vm6, %v673_v24 }
 0x18d   : > { %v772_v25 = vpop.permute.xlu1 %771 }
 0x18e   : > { %v770_v26 = vpop.permute.xlu0 %769  ;;  %807 = vst.msk [vmem:[#allocation3 + $0x68] sm:$0xff] %vm793_vm7, %v772_v25 }
 0x18f   : > { %806 = vst.msk [vmem:[#allocation3 + $0x60] sm:$0xff] %vm793_vm7, %v770_v26 }
 0x191   : > { %v869_v27 = vpop.permute.xlu1 %868 }
 0x192   : > { %v867_v28 = vpop.permute.xlu0 %866  ;;  %904 = vst.msk [vmem:[#allocation3 + $0x68] sm:$0xff] %vm890_vm8, %v869_v27 }
 0x193   : > { %903 = vst.msk [vmem:[#allocation3 + $0x60] sm:$0xff] %vm890_vm8, %v867_v28 }
 0x195   : > { %v969_v29 = vpop.permute.xlu1 %968 }
 0x196   : > { %v967_v30 = vpop.permute.xlu0 %966  ;;  %1004 = vst.msk [vmem:[#allocation3 + $0x68] sm:$0xff] %vm990_vm9, %v969_v29 }
 0x197   : > { %1003 = vst.msk [vmem:[#allocation3 + $0x60] sm:$0xff] %vm990_vm9, %v967_v30 }
 0x199   : > { %v1066_v31 = vpop.permute.xlu1 %1065 }
 0x19a   : > { %v1064_v32 = vpop.permute.xlu0 %1063  ;;  %1101 = vst.msk [vmem:[#allocation3 + $0x68] sm:$0xff] %vm1087_vm10, %v1066_v31 }
 0x19b   : > { %1100 = vst.msk [vmem:[#allocation3 + $0x60] sm:$0xff] %vm1087_vm10, %v1064_v32 }
 0x19d   : > { %v1163_v33 = vpop.permute.xlu1 %1162 }
 0x19e   : > { %v1161_v34 = vpop.permute.xlu0 %1160  ;;  %1198 = vst.msk [vmem:[#allocation3 + $0x68] sm:$0xff] %vm1184_vm11, %v1163_v33 }
 0x19f   : > { %1197 = vst.msk [vmem:[#allocation3 + $0x60] sm:$0xff] %vm1184_vm11, %v1161_v34 }
 0x1a1   : > { %v482_v35 = vpop.permute.xlu1 %481 }
 0x1a2   : > { %v480_v36 = vpop.permute.xlu0 %479  ;;  %515 = vst.msk [vmem:[#allocation3 + $0x78] sm:$0xff] %vm499_vm4, %v482_v35 }
 0x1a3   : > { %514 = vst.msk [vmem:[#allocation3 + $0x70] sm:$0xff] %vm499_vm4, %v480_v36 }
 0x1a5   : > { %v579_v37 = vpop.permute.xlu1 %578  ;;  %v1215_v40 = vld [vmem:[#allocation3 + $0x68] sm:$0xff] }
 0x1a6   : > { %v577_v38 = vpop.permute.xlu0 %576  ;;  %v1214_v39 = vld [vmem:[#allocation3 + $0x60] sm:$0xff]  ;;  %612 = vst.msk [vmem:[#allocation3 + $0x78] sm:$0xff] %vm596_vm5, %v579_v37 }
 0x1a7   : > { %611 = vst.msk [vmem:[#allocation3 + $0x70] sm:$0xff] %vm596_vm5, %v577_v38  ;;  %v1641_v41 = vpack.c.bf16 %v1215_v40, %v1214_v39 }
 0x1a9   : > { %1642 = vmatpush3.bf16.xpose.msra.mxu0 %v1641_v41  ;;  %v679_v42 = vpop.permute.xlu1 %678 }
 0x1aa   : > { %v677_v43 = vpop.permute.xlu0 %676  ;;  %1643 = vmatprep.subr.bf16.mxu0 %v1746_v59  ;;  %712 = vst.msk [vmem:[#allocation3 + $0x78] sm:$0xff] %vm696_vm6, %v679_v42 }
 0x1ab   : > { %711 = vst.msk [vmem:[#allocation3 + $0x70] sm:$0xff] %vm696_vm6, %v677_v43 }
 0x1ad   : > { %v776_v44 = vpop.permute.xlu1 %775 }
 0x1ae   : > { %v774_v45 = vpop.permute.xlu0 %773  ;;  %809 = vst.msk [vmem:[#allocation3 + $0x78] sm:$0xff] %vm793_vm7, %v776_v44 }
 0x1af   : > { %808 = vst.msk [vmem:[#allocation3 + $0x70] sm:$0xff] %vm793_vm7, %v774_v45 }
 0x1b1   : > { %v873_v46 = vpop.permute.xlu1 %872 }
 0x1b2   : > { %v871_v47 = vpop.permute.xlu0 %870  ;;  %906 = vst.msk [vmem:[#allocation3 + $0x78] sm:$0xff] %vm890_vm8, %v873_v46 }
 0x1b3   : > { %905 = vst.msk [vmem:[#allocation3 + $0x70] sm:$0xff] %vm890_vm8, %v871_v47 }
 0x1b5   : > { %v973_v48 = vpop.permute.xlu1 %972 }
 0x1b6   : > { %v971_v49 = vpop.permute.xlu0 %970  ;;  %1006 = vst.msk [vmem:[#allocation3 + $0x78] sm:$0xff] %vm990_vm9, %v973_v48 }
 0x1b7   : > { %1005 = vst.msk [vmem:[#allocation3 + $0x70] sm:$0xff] %vm990_vm9, %v971_v49 }
 0x1b9   : > { %v1070_v59 = vpop.permute.xlu1 %1069 }
 0x1ba   : > { %v1068_v50 = vpop.permute.xlu0 %1067  ;;  %1103 = vst.msk [vmem:[#allocation3 + $0x78] sm:$0xff] %vm1087_vm10, %v1070_v59 }
 0x1bb   : > { %1102 = vst.msk [vmem:[#allocation3 + $0x70] sm:$0xff] %vm1087_vm10, %v1068_v50 }
 0x1bd   : > { %v1167_v51 = vpop.permute.xlu1 %1166 }
 0x1be   : > { %v1165_v52 = vpop.permute.xlu0 %1164  ;;  %1200 = vst.msk [vmem:[#allocation3 + $0x78] sm:$0xff] %vm1184_vm11, %v1167_v51 }
 0x1bf   : > { %1199 = vst.msk [vmem:[#allocation3 + $0x70] sm:$0xff] %vm1184_vm11, %v1165_v52 }
 0x1c5   : > { %v1217_v54 = vld [vmem:[#allocation3 + $0x78] sm:$0xff] }
 0x1c6   : > { %v1216_v53 = vld [vmem:[#allocation3 + $0x70] sm:$0xff] }
 0x1c7   : > { %v1644_v55 = vpack.c.bf16 %v1217_v54, %v1216_v53 }
 0x1c9   : > { %1645 = vmatpush3.bf16.xpose.msra.mxu0 %v1644_v55 }
 0x1d0   : > { %1620 = vmatmul.mubr.f32.vlgmr.msra.gmra.mrb[0].mxu0 %v1201_v56 }
 0x2a3   : > { %v1284_v57 = vpop.f32.mrb[0].mxu0 }
 0x2a4   : > { %1288 = vst [vmem:[%s1817_s7] sm:$0xff] %v1284_v57  ;;  %v1296_v58 = vmul.f32 %v1284_v57, %v1284_v57  ;;  %1290 = vadd.xlane.f32.xlu0 %v1284_v57  ;;  %v1621_v62 = vpop.f32.mrb[1].mxu0 }
 0x2a6   : > { %1297 = vadd.xlane.f32.xlu1 %v1296_v58 }
 0x331   : > { %v1291_v0 = vpop.xlane.xlu0 %1290 }
 0x332   : > { %v1292_v2 = vadd.f32 %v1291_v0, %v1289_v63 }
 0x333   : > { %v1298_v3 = vpop.xlane.xlu1 %1297 }
 0x334   : > { %1294 = vst.msk [vmem:[%s1822_s10] sm:$0xff] %vm1293_vm13, %v1292_v2  ;;  %v1299_v4 = vadd.f32 %v1298_v3, %v1295_v1 }
 0x336   : > { %1300 = vst.msk [vmem:[%s1827_s13] sm:$0xff] %vm1293_vm13, %v1299_v4 }
 0x337 PF: > { %s15_s19 = sadd.s32 1, %s1736_s19   ;;  %s2512_s15 = smov %s1728_s17 }
 0x338   : > { %p12_p8 = scmp.ge.s32.totalorder %s15_s19, 6   ;;  %s2513_s16 = smov %s1732_s18 }
 0x339   : > { %s2514_s17 = smov %s2517_s20  ;;  %s2515_s18 = smov %s2521_s21 }
 0x33a   :  { %14 = sbr.rel (!%p12_p8) target bundleno = 3 (0x3), region = 90 }

</bundles_post_ra>
